<compile_context>
chip_gen: v6e
topology: v6e:2x2x1
jax: 0.10.0
libtpu: 0.0.40
codegen_flags: <defaults>
</compile_context>

<pallas_src>
import functools

import jax
import jax.numpy as jnp
from jax.experimental import pallas as pl
from jax.experimental.pallas import tpu as pltpu

LS = 120       # hidden width of the PyTorch module
LS_PAD = 128   # lane/sublane-aligned padded hidden width


def _sigmoid(z):
    # Single EUP tanh per element (vs. exp + reciprocal).
    return 0.5 * jnp.tanh(0.5 * z) + 0.5


def _mlp_kernel(x_ref,
                w1, b1, w2, b2, w3, b3, w4, b4, w5, b5, w6, b6,
                o_ref):
    """Whole MLP forward for one batch tile; batch on lanes, hidden on sublanes."""
    x = x_ref[...].astype(jnp.float32)                          # (1, tile)

    # Layer 1: K=1 -> outer product on the VPU (no MXU push/pop).
    z = w1[...].astype(jnp.float32) * x + b1[...].astype(jnp.float32)   # (128, tile)
    h = _sigmoid(z)

    # Layers 2..5: real 128x128 matmuls on the MXU, f32 accumulation.
    def lin_sig(h, w_ref, b_ref):
        z = jnp.dot(w_ref[...], h.astype(w_ref.dtype),
                    preferred_element_type=jnp.float32)
        z = z + b_ref[...].astype(jnp.float32)
        return _sigmoid(z)

    h = lin_sig(h, w2, b2)
    h = lin_sig(h, w3, b3)
    h = lin_sig(h, w4, b4)
    h = lin_sig(h, w5, b5)

    # Layer 6: (1,128) x (128,tile) -> lane-dense (1, tile) output row.
    out = jnp.dot(w6[...], h.astype(w6.dtype),
                  preferred_element_type=jnp.float32)
    out = out + b6[...].astype(jnp.float32)
    o_ref[...] = out.astype(o_ref.dtype)


def pad_params(params, weight_dtype=jnp.float32):
    """Pad PyTorch-layout params (W:(out,in), b:(out,)) from width 120 to 128.

    Called ONCE at init time (hoisted out of the forward path).  Padded output
    rows and biases are zero, so padded sublanes of every activation carry
    sigmoid(0)=0.5; the padded input COLUMNS of every following weight are
    zero, so those sublanes contribute exactly 0 downstream.  Weights may be
    cast to bf16 (MXU-native, half the DMA); biases stay f32.
    """
    (w1, b1), (w2, b2), (w3, b3), (w4, b4), (w5, b5), (w6, b6) = params
    p = LS_PAD - LS

    flat = [
        jnp.pad(w1, ((0, p), (0, 0))).astype(weight_dtype),          # (128, 1)
        jnp.pad(b1.reshape(-1, 1), ((0, p), (0, 0))),                 # (128, 1) f32
    ]
    for w, b in ((w2, b2), (w3, b3), (w4, b4), (w5, b5)):
        flat.append(jnp.pad(w, ((0, p), (0, p))).astype(weight_dtype))        # (128,128)
        flat.append(jnp.pad(b.reshape(-1, 1), ((0, p), (0, 0))))              # (128,1) f32
    flat.append(jnp.pad(w6, ((0, 0), (0, p))).astype(weight_dtype))  # (1, 128)
    flat.append(b6.reshape(1, 1))                                    # (1, 1) f32
    return flat


@functools.partial(jax.jit, static_argnames=("batch_tile",))
def network_forward(x, flat_params, *, batch_tile=None):
    """x: (B, 1) float32.  flat_params: output of pad_params (already padded)."""
    B, F = x.shape
    assert F == 1
    if batch_tile is None:
        # >=2 grid steps for large batches so v7x can shard across both TCs;
        # single step for small batches (no per-step overhead).
        batch_tile = 256 if (B > 256 and B % 256 == 0) else B
    assert B % batch_tile == 0, "pick B divisible by batch_tile"
    assert batch_tile == B or batch_tile % 128 == 0, "partial tiles must be lane aligned"

    xr = x.reshape(1, B).astype(jnp.float32)   # lane-dense: batch on lanes

    def const_spec(arr):
        return pl.BlockSpec(arr.shape, lambda i: (0, 0))   # weights resident

    in_specs = [pl.BlockSpec((1, batch_tile), lambda i: (0, i))]
    in_specs += [const_spec(a) for a in flat_params]
    out_spec = pl.BlockSpec((1, batch_tile), lambda i: (0, i))

    out = pl.pallas_call(
        _mlp_kernel,
        out_shape=jax.ShapeDtypeStruct((1, B), jnp.float32),
        grid_spec=pltpu.PrefetchScalarGridSpec(
            num_scalar_prefetch=0,
            grid=(B // batch_tile,),
            in_specs=in_specs,
            out_specs=out_spec,
        ),
        compiler_params=pltpu.CompilerParams(
            dimension_semantics=("parallel",)),
    )(xr, *flat_params)
    return out.reshape(B, 1)


def init_params(key):
    """Deterministic init matching the PyTorch Linear shapes (W:(out,in), b:(out,))."""
    dims = [(1, LS), (LS, LS), (LS, LS), (LS, LS), (LS, LS), (LS, 1)]
    params = []
    for fan_in, fan_out in dims:
        key, kw, kb = jax.random.split(key, 3)
        bound = float(1.0 / (fan_in ** 0.5))
        w = jax.random.uniform(kw, (fan_out, fan_in), jnp.float32, -bound, bound)
        b = jax.random.uniform(kb, (fan_out,), jnp.float32, -bound, bound)
        params.append((w, b))
    return params


def reference_forward(x, params, weight_dtype=jnp.float32):
    """Plain-JAX reference.  With weight_dtype=bf16 it emulates the kernel's
    mixed-precision scheme (bf16 weights / MXU inputs, f32 accumulation)."""
    h = x
    n = len(params)
    for i, (w, b) in enumerate(params):
        w = w.astype(weight_dtype).astype(jnp.float32)
        if i > 0:
            h = h.astype(weight_dtype).astype(jnp.float32)
        h = h @ w.T + b
        if i < n - 1:
            h = jax.nn.sigmoid(h)
    return h


if __name__ == "__main__":
    key = jax.random.PRNGKey(0)
    kx, kp = jax.random.split(key)

    B = 1024                     # many Lotka-Volterra time points per call
    x = jax.random.uniform(kx, (B, 1), jnp.float32, 0.0, 10.0)
    params = init_params(kp)

    # --- f32 weights: exact module semantics -------------------------------
    flat_f32 = pad_params(params, weight_dtype=jnp.float32)   # padded ONCE
    out = jax.block_until_ready(network_forward(x, flat_f32))
    ref = reference_forward(x, params)
    assert out.shape == (B, 1)
    assert jnp.allclose(out, ref, atol=1e-4, rtol=1e-4), "f32 mismatch vs. reference"

    # --- bf16 weights: MXU-native, half the weight DMA ---------------------
    flat_bf16 = pad_params(params, weight_dtype=jnp.bfloat16)
    out_bf = jax.block_until_ready(network_forward(x, flat_bf16))
    ref_bf = reference_forward(x, params, weight_dtype=jnp.bfloat16)
    assert jnp.allclose(out_bf, ref_bf, atol=2e-3, rtol=2e-3), "bf16 mismatch vs. reference"

    print("KERNEL_OK")
</pallas_src>

<mosaic_0001>
module attributes {stable_mosaic.version = 11 : i64} {
  func.func @_mlp_kernel(%arg0: i32, %arg1: memref<1x256xf32, #tpu.memory_space<vmem>>, %arg2: memref<128x1xf32, #tpu.memory_space<vmem>>, %arg3: memref<128x1xf32, #tpu.memory_space<vmem>>, %arg4: memref<128x128xf32, #tpu.memory_space<vmem>>, %arg5: memref<128x1xf32, #tpu.memory_space<vmem>>, %arg6: memref<128x128xf32, #tpu.memory_space<vmem>>, %arg7: memref<128x1xf32, #tpu.memory_space<vmem>>, %arg8: memref<128x128xf32, #tpu.memory_space<vmem>>, %arg9: memref<128x1xf32, #tpu.memory_space<vmem>>, %arg10: memref<128x128xf32, #tpu.memory_space<vmem>>, %arg11: memref<128x1xf32, #tpu.memory_space<vmem>>, %arg12: memref<1x128xf32, #tpu.memory_space<vmem>>, %arg13: memref<1x1xf32, #tpu.memory_space<vmem>>, %arg14: memref<1x256xf32, #tpu.memory_space<vmem>>) attributes {dimension_semantics = [#tpu.dimension_semantics<parallel>], iteration_bounds = array<i64: 4>, scalar_prefetch = 0 : i64, scratch_operands = 0 : i64, tpu.core_type = #tpu.core_type<tc>, window_params = [{transform_indices = @transform_0, window_bounds = array<i64: 1, 256>}, {pipeline_mode = #tpu.pipeline_mode<synchronous>, transform_indices = @transform_1, window_bounds = array<i64: 128, 1>}, {pipeline_mode = #tpu.pipeline_mode<synchronous>, transform_indices = @transform_2, window_bounds = array<i64: 128, 1>}, {pipeline_mode = #tpu.pipeline_mode<synchronous>, transform_indices = @transform_3, window_bounds = array<i64: 128, 128>}, {pipeline_mode = #tpu.pipeline_mode<synchronous>, transform_indices = @transform_4, window_bounds = array<i64: 128, 1>}, {pipeline_mode = #tpu.pipeline_mode<synchronous>, transform_indices = @transform_5, window_bounds = array<i64: 128, 128>}, {pipeline_mode = #tpu.pipeline_mode<synchronous>, transform_indices = @transform_6, window_bounds = array<i64: 128, 1>}, {pipeline_mode = #tpu.pipeline_mode<synchronous>, transform_indices = @transform_7, window_bounds = array<i64: 128, 128>}, {pipeline_mode = #tpu.pipeline_mode<synchronous>, transform_indices = @transform_8, window_bounds = array<i64: 128, 1>}, {pipeline_mode = #tpu.pipeline_mode<synchronous>, transform_indices = @transform_9, window_bounds = array<i64: 128, 128>}, {pipeline_mode = #tpu.pipeline_mode<synchronous>, transform_indices = @transform_10, window_bounds = array<i64: 128, 1>}, {pipeline_mode = #tpu.pipeline_mode<synchronous>, transform_indices = @transform_11, window_bounds = array<i64: 1, 128>}, {pipeline_mode = #tpu.pipeline_mode<synchronous>, transform_indices = @transform_12, window_bounds = array<i64: 1, 1>}, {transform_indices = @transform_13, window_bounds = array<i64: 1, 256>}]} {
    %c0 = arith.constant 0 : index
    %c0_0 = arith.constant 0 : index
    %0 = vector.load %arg1[%c0, %c0_0] : memref<1x256xf32, #tpu.memory_space<vmem>>, vector<1x256xf32>
    %c0_1 = arith.constant 0 : index
    %c0_2 = arith.constant 0 : index
    %1 = vector.load %arg2[%c0_1, %c0_2] : memref<128x1xf32, #tpu.memory_space<vmem>>, vector<128x1xf32>
    %2 = vector.broadcast %1 : vector<128x1xf32> to vector<128x256xf32>
    %3 = vector.broadcast %0 : vector<1x256xf32> to vector<128x256xf32>
    %4 = arith.mulf %2, %3 : vector<128x256xf32>
    %c0_3 = arith.constant 0 : index
    %c0_4 = arith.constant 0 : index
    %5 = vector.load %arg3[%c0_3, %c0_4] : memref<128x1xf32, #tpu.memory_space<vmem>>, vector<128x1xf32>
    %6 = vector.broadcast %5 : vector<128x1xf32> to vector<128x256xf32>
    %7 = arith.addf %4, %6 : vector<128x256xf32>
    %cst = arith.constant 5.000000e-01 : f32
    %8 = vector.broadcast %cst : f32 to vector<128x256xf32>
    %9 = arith.mulf %8, %7 : vector<128x256xf32>
    %10 = math.tanh %9 : vector<128x256xf32>
    %cst_5 = arith.constant 5.000000e-01 : f32
    %11 = vector.broadcast %cst_5 : f32 to vector<128x256xf32>
    %12 = arith.mulf %11, %10 : vector<128x256xf32>
    %cst_6 = arith.constant 5.000000e-01 : f32
    %13 = vector.broadcast %cst_6 : f32 to vector<128x256xf32>
    %14 = arith.addf %12, %13 : vector<128x256xf32>
    %c0_7 = arith.constant 0 : index
    %c0_8 = arith.constant 0 : index
    %15 = vector.load %arg4[%c0_7, %c0_8] : memref<128x128xf32, #tpu.memory_space<vmem>>, vector<128x128xf32>
    %cst_9 = arith.constant dense<0.000000e+00> : vector<128x256xf32>
    %16 = tpu.matmul %15, %14, %cst_9 {dimension_numbers = #tpu.dot_dimension_numbers<[1], [0], [0], [1], [0, 0, 1, 1], [], []>} : vector<128x128xf32>, vector<128x256xf32>, vector<128x256xf32> -> vector<128x256xf32>
    %c0_10 = arith.constant 0 : index
    %c0_11 = arith.constant 0 : index
    %17 = vector.load %arg5[%c0_10, %c0_11] : memref<128x1xf32, #tpu.memory_space<vmem>>, vector<128x1xf32>
    %18 = vector.broadcast %17 : vector<128x1xf32> to vector<128x256xf32>
    %19 = arith.addf %16, %18 : vector<128x256xf32>
    %cst_12 = arith.constant 5.000000e-01 : f32
    %20 = vector.broadcast %cst_12 : f32 to vector<128x256xf32>
    %21 = arith.mulf %20, %19 : vector<128x256xf32>
    %22 = math.tanh %21 : vector<128x256xf32>
    %cst_13 = arith.constant 5.000000e-01 : f32
    %23 = vector.broadcast %cst_13 : f32 to vector<128x256xf32>
    %24 = arith.mulf %23, %22 : vector<128x256xf32>
    %cst_14 = arith.constant 5.000000e-01 : f32
    %25 = vector.broadcast %cst_14 : f32 to vector<128x256xf32>
    %26 = arith.addf %24, %25 : vector<128x256xf32>
    %c0_15 = arith.constant 0 : index
    %c0_16 = arith.constant 0 : index
    %27 = vector.load %arg6[%c0_15, %c0_16] : memref<128x128xf32, #tpu.memory_space<vmem>>, vector<128x128xf32>
    %cst_17 = arith.constant dense<0.000000e+00> : vector<128x256xf32>
    %28 = tpu.matmul %27, %26, %cst_17 {dimension_numbers = #tpu.dot_dimension_numbers<[1], [0], [0], [1], [0, 0, 1, 1], [], []>} : vector<128x128xf32>, vector<128x256xf32>, vector<128x256xf32> -> vector<128x256xf32>
    %c0_18 = arith.constant 0 : index
    %c0_19 = arith.constant 0 : index
    %29 = vector.load %arg7[%c0_18, %c0_19] : memref<128x1xf32, #tpu.memory_space<vmem>>, vector<128x1xf32>
    %30 = vector.broadcast %29 : vector<128x1xf32> to vector<128x256xf32>
    %31 = arith.addf %28, %30 : vector<128x256xf32>
    %cst_20 = arith.constant 5.000000e-01 : f32
    %32 = vector.broadcast %cst_20 : f32 to vector<128x256xf32>
    %33 = arith.mulf %32, %31 : vector<128x256xf32>
    %34 = math.tanh %33 : vector<128x256xf32>
    %cst_21 = arith.constant 5.000000e-01 : f32
    %35 = vector.broadcast %cst_21 : f32 to vector<128x256xf32>
    %36 = arith.mulf %35, %34 : vector<128x256xf32>
    %cst_22 = arith.constant 5.000000e-01 : f32
    %37 = vector.broadcast %cst_22 : f32 to vector<128x256xf32>
    %38 = arith.addf %36, %37 : vector<128x256xf32>
    %c0_23 = arith.constant 0 : index
    %c0_24 = arith.constant 0 : index
    %39 = vector.load %arg8[%c0_23, %c0_24] : memref<128x128xf32, #tpu.memory_space<vmem>>, vector<128x128xf32>
    %cst_25 = arith.constant dense<0.000000e+00> : vector<128x256xf32>
    %40 = tpu.matmul %39, %38, %cst_25 {dimension_numbers = #tpu.dot_dimension_numbers<[1], [0], [0], [1], [0, 0, 1, 1], [], []>} : vector<128x128xf32>, vector<128x256xf32>, vector<128x256xf32> -> vector<128x256xf32>
    %c0_26 = arith.constant 0 : index
    %c0_27 = arith.constant 0 : index
    %41 = vector.load %arg9[%c0_26, %c0_27] : memref<128x1xf32, #tpu.memory_space<vmem>>, vector<128x1xf32>
    %42 = vector.broadcast %41 : vector<128x1xf32> to vector<128x256xf32>
    %43 = arith.addf %40, %42 : vector<128x256xf32>
    %cst_28 = arith.constant 5.000000e-01 : f32
    %44 = vector.broadcast %cst_28 : f32 to vector<128x256xf32>
    %45 = arith.mulf %44, %43 : vector<128x256xf32>
    %46 = math.tanh %45 : vector<128x256xf32>
    %cst_29 = arith.constant 5.000000e-01 : f32
    %47 = vector.broadcast %cst_29 : f32 to vector<128x256xf32>
    %48 = arith.mulf %47, %46 : vector<128x256xf32>
    %cst_30 = arith.constant 5.000000e-01 : f32
    %49 = vector.broadcast %cst_30 : f32 to vector<128x256xf32>
    %50 = arith.addf %48, %49 : vector<128x256xf32>
    %c0_31 = arith.constant 0 : index
    %c0_32 = arith.constant 0 : index
    %51 = vector.load %arg10[%c0_31, %c0_32] : memref<128x128xf32, #tpu.memory_space<vmem>>, vector<128x128xf32>
    %cst_33 = arith.constant dense<0.000000e+00> : vector<128x256xf32>
    %52 = tpu.matmul %51, %50, %cst_33 {dimension_numbers = #tpu.dot_dimension_numbers<[1], [0], [0], [1], [0, 0, 1, 1], [], []>} : vector<128x128xf32>, vector<128x256xf32>, vector<128x256xf32> -> vector<128x256xf32>
    %c0_34 = arith.constant 0 : index
    %c0_35 = arith.constant 0 : index
    %53 = vector.load %arg11[%c0_34, %c0_35] : memref<128x1xf32, #tpu.memory_space<vmem>>, vector<128x1xf32>
    %54 = vector.broadcast %53 : vector<128x1xf32> to vector<128x256xf32>
    %55 = arith.addf %52, %54 : vector<128x256xf32>
    %cst_36 = arith.constant 5.000000e-01 : f32
    %56 = vector.broadcast %cst_36 : f32 to vector<128x256xf32>
    %57 = arith.mulf %56, %55 : vector<128x256xf32>
    %58 = math.tanh %57 : vector<128x256xf32>
    %cst_37 = arith.constant 5.000000e-01 : f32
    %59 = vector.broadcast %cst_37 : f32 to vector<128x256xf32>
    %60 = arith.mulf %59, %58 : vector<128x256xf32>
    %cst_38 = arith.constant 5.000000e-01 : f32
    %61 = vector.broadcast %cst_38 : f32 to vector<128x256xf32>
    %62 = arith.addf %60, %61 : vector<128x256xf32>
    %c0_39 = arith.constant 0 : index
    %c0_40 = arith.constant 0 : index
    %63 = vector.load %arg12[%c0_39, %c0_40] : memref<1x128xf32, #tpu.memory_space<vmem>>, vector<1x128xf32>
    %cst_41 = arith.constant dense<0.000000e+00> : vector<1x256xf32>
    %64 = tpu.matmul %63, %62, %cst_41 {dimension_numbers = #tpu.dot_dimension_numbers<[1], [0], [0], [1], [0, 0, 1, 1], [], []>} : vector<1x128xf32>, vector<128x256xf32>, vector<1x256xf32> -> vector<1x256xf32>
    %c0_42 = arith.constant 0 : index
    %c0_43 = arith.constant 0 : index
    %65 = vector.load %arg13[%c0_42, %c0_43] : memref<1x1xf32, #tpu.memory_space<vmem>>, vector<1x1xf32>
    %66 = vector.broadcast %65 : vector<1x1xf32> to vector<1x256xf32>
    %67 = arith.addf %64, %66 : vector<1x256xf32>
    %c0_44 = arith.constant 0 : index
    %c0_45 = arith.constant 0 : index
    %68 = vector.load %arg14[%c0_44, %c0_45] : memref<1x256xf32, #tpu.memory_space<vmem>>, vector<1x256xf32>
    tpu.vector_store %arg14[%c0_44, %c0_45], %67 {strides = array<i32>} : memref<1x256xf32, #tpu.memory_space<vmem>>, vector<1x256xf32>,
    return
  }
  func.func @transform_0(%arg0: i32) -> (i32, i32) {
    %c0_i32 = arith.constant 0 : i32
    %c0_i32_0 = arith.constant 0 : i32
    return %c0_i32, %arg0 : i32, i32
  }
  func.func @transform_1(%arg0: i32) -> (i32, i32) {
    %c0_i32 = arith.constant 0 : i32
    %c0_i32_0 = arith.constant 0 : i32
    %c0_i32_1 = arith.constant 0 : i32
    return %c0_i32, %c0_i32_0 : i32, i32
  }
  func.func @transform_2(%arg0: i32) -> (i32, i32) {
    %c0_i32 = arith.constant 0 : i32
    %c0_i32_0 = arith.constant 0 : i32
    %c0_i32_1 = arith.constant 0 : i32
    return %c0_i32, %c0_i32_0 : i32, i32
  }
  func.func @transform_3(%arg0: i32) -> (i32, i32) {
    %c0_i32 = arith.constant 0 : i32
    %c0_i32_0 = arith.constant 0 : i32
    %c0_i32_1 = arith.constant 0 : i32
    return %c0_i32, %c0_i32_0 : i32, i32
  }
  func.func @transform_4(%arg0: i32) -> (i32, i32) {
    %c0_i32 = arith.constant 0 : i32
    %c0_i32_0 = arith.constant 0 : i32
    %c0_i32_1 = arith.constant 0 : i32
    return %c0_i32, %c0_i32_0 : i32, i32
  }
  func.func @transform_5(%arg0: i32) -> (i32, i32) {
    %c0_i32 = arith.constant 0 : i32
    %c0_i32_0 = arith.constant 0 : i32
    %c0_i32_1 = arith.constant 0 : i32
    return %c0_i32, %c0_i32_0 : i32, i32
  }
  func.func @transform_6(%arg0: i32) -> (i32, i32) {
    %c0_i32 = arith.constant 0 : i32
    %c0_i32_0 = arith.constant 0 : i32
    %c0_i32_1 = arith.constant 0 : i32
    return %c0_i32, %c0_i32_0 : i32, i32
  }
  func.func @transform_7(%arg0: i32) -> (i32, i32) {
    %c0_i32 = arith.constant 0 : i32
    %c0_i32_0 = arith.constant 0 : i32
    %c0_i32_1 = arith.constant 0 : i32
    return %c0_i32, %c0_i32_0 : i32, i32
  }
  func.func @transform_8(%arg0: i32) -> (i32, i32) {
    %c0_i32 = arith.constant 0 : i32
    %c0_i32_0 = arith.constant 0 : i32
    %c0_i32_1 = arith.constant 0 : i32
    return %c0_i32, %c0_i32_0 : i32, i32
  }
  func.func @transform_9(%arg0: i32) -> (i32, i32) {
    %c0_i32 = arith.constant 0 : i32
    %c0_i32_0 = arith.constant 0 : i32
    %c0_i32_1 = arith.constant 0 : i32
    return %c0_i32, %c0_i32_0 : i32, i32
  }
  func.func @transform_10(%arg0: i32) -> (i32, i32) {
    %c0_i32 = arith.constant 0 : i32
    %c0_i32_0 = arith.constant 0 : i32
    %c0_i32_1 = arith.constant 0 : i32
    return %c0_i32, %c0_i32_0 : i32, i32
  }
  func.func @transform_11(%arg0: i32) -> (i32, i32) {
    %c0_i32 = arith.constant 0 : i32
    %c0_i32_0 = arith.constant 0 : i32
    %c0_i32_1 = arith.constant 0 : i32
    return %c0_i32, %c0_i32_0 : i32, i32
  }
  func.func @transform_12(%arg0: i32) -> (i32, i32) {
    %c0_i32 = arith.constant 0 : i32
    %c0_i32_0 = arith.constant 0 : i32
    %c0_i32_1 = arith.constant 0 : i32
    return %c0_i32, %c0_i32_0 : i32, i32
  }
  func.func @transform_13(%arg0: i32) -> (i32, i32) {
    %c0_i32 = arith.constant 0 : i32
    %c0_i32_0 = arith.constant 0 : i32
    return %c0_i32, %arg0 : i32, i32
  }
}

</mosaic_0001>

<bundles_post_ra>
// kernel: network_forward.1
= control target key start
LH: loop header
LB: loop body
LE: loop exit
PB: predicated region body
PF: predicated region fallthrough
CT: control target
= control target key end

     0   :  { %s4045_s0 = inlined_call_operand.vmem [shape: f32[1,1024], index: 0, kind: input, shape index: {}]   ;;  %s4046_s1 = inlined_call_operand.vmem [shape: f32[128,1], index: 1, kind: input, shape index: {}]   ;;  %s4047_s2 = inlined_call_operand.vmem [shape: f32[128,1], index: 2, kind: input, shape index: {}]   ;;  %s4048_s3 = inlined_call_operand.vmem [shape: f32[128,128], index: 3, kind: input, shape index: {}]   ;;  %s4049_s4 = inlined_call_operand.vmem [shape: f32[128,1], index: 4, kind: input, shape index: {}]   ;;  %s4050_s5 = inlined_call_operand.vmem [shape: f32[128,128], index: 5, kind: input, shape index: {}]   ;;  %s4051_s6 = inlined_call_operand.vmem [shape: f32[128,1], index: 6, kind: input, shape index: {}]   ;;  %s4052_s7 = inlined_call_operand.vmem [shape: f32[128,128], index: 7, kind: input, shape index: {}]   ;;  %s4053_s8 = inlined_call_operand.vmem [shape: f32[128,1], index: 8, kind: input, shape index: {}]   ;;  %s4054_s9 = inlined_call_operand.vmem [shape: f32[128,128], index: 9, kind: input, shape index: {}]   ;;  %s4055_s10 = inlined_call_operand.vmem [shape: f32[128,1], index: 10, kind: input, shape index: {}]   ;;  %s4056_s11 = inlined_call_operand.vmem [shape: f32[1,128], index: 11, kind: input, shape index: {}]   ;;  %s4057_s12 = inlined_call_operand.<no memory space> [shape: f32[1,1], index: 12, kind: input, shape index: {}]   ;;  %s4058_s13 = inlined_call_operand.hbm [shape: f32[1,1024], index: 13, kind: output, shape index: {}]  }
   0x1   :  { %4059 = sst [smem:[#allocation7_spill]] %s4045_s0  ;;  %v18_v0 = vstv %s4057_s12 }
   0x2   :  { %4060 = sst [smem:[#allocation8_spill]] %s4046_s1  ;;  %19 = vst [vmem:[#allocation2] sm:$0x1] %v18_v0 }
   0x3   :  { %20 = vsyncpa [#allocation4], 0 }
   0x4   :  { %22 = vsyncpa [#allocation4 + $0x1], 0  ;;  %s3132_s27 = smov 0   ;;  %s3134_s28 = smov 0  }
   0x5   :  { %s3136_s29 = smov 0   ;;  %s3138_s30 = smov 0  }
   0x6 LB: > { %s3153_s12 = sadd.s32 4294967295, %s3053_s30   ;;  %s2617_s14 = sadd.s32 4294967294, %s3053_s30   ;;  %s3053_s30 = sphi %s3138_s30, %s4070_s30   ;;  %s3049_s29 = sphi %s3136_s29, %s4069_s29   ;;  %s3045_s28 = sphi %s3134_s28, %s4068_s28   ;;  %s3041_s27 = sphi %s3132_s27, %s4067_s27  }
   0x7   : > { %s3157_s15 = sadd.s32 1, %s3053_s30   ;;  %s313_s16 = sadd.s32 1, %s3049_s29 }
   0x8   : > { %s310_s17 = ssub.s32 %s3053_s30, %s3157_s15  ;;  %p323_p0 = scmp.ne.s32.totalorder %s3049_s29, %s3045_s28 }
   0x9   : > { %p311_p1 = scmp.eq.s32.totalorder %s310_s17, 0  ;;  %p324_p2 = scmp.eq.s32.totalorder %s3153_s12, 3 }
   0xa   : > { %p329_p3 = scmp.ne.s32.totalorder %s3045_s28, %s3041_s27  ;;  %p330_p4 = scmp.eq.s32.totalorder %s2617_s14, 3 }
   0xb   : > { %s3168_s18 = scalar_select %p311_p1, %s3049_s29, %s313_s16  }
   0xc   : > { %p3170_p5 = por %p324_p2, %p323_p0  ;;  %p3174_p6 = por %p330_p4, %p329_p3 }
   0xd   : > { %4061 = sst [smem:[#allocation6_spill]] %s3168_s18  ;;  %p2620_p7 = scmp.ge.s32.totalorder %s3053_s30, 1 }
   0xe   : > { %p392_p8 = scmp.lt.s32.totalorder %s3053_s30, 5 }
  0x10   : > { %p393_p9 = pnand %p2620_p7, %p392_p8 }
  0x11   : > { %s4064_s1 = sld [smem:[#allocation8_spill]] (!%p393_p9)  ;;  %s2622_s17 = sshll.u32 (!%p393_p9), %s3153_s12, 1 }
  0x12   : > { %396 = sbr.rel (%p393_p9) target bundleno = 1688 (0x698), region = 72  ;;  %p436_p10 = scmp.lt.s32.totalorder (!%p393_p9), %s2622_s17, 7 }
  0x13   : > { %s4065_s0 = sld [smem:[#allocation7_spill]] (!%p393_p9)  ;;  %s432_s16 = sand.u32 (!%p393_p9), 1, %s3045_s28  }
  0x14   : > { %s2621_s21 = sshll.u32 (!%p393_p9), %s432_s16, 1  ;;  %s2547_s26 = scalar_lea.sflag (!%p393_p9), [#allocation4], %s432_s16 }
  0x15   : > { %s434_s22 = scalar_lea.vmem (!%p393_p9), [#allocation3], %s2621_s21 }
  0x16   : > { %s2561_s23 = sshll.u32 (!%p393_p9), %s434_s22, 4  ;;  %s2562_s23 = int_to_ptr.vmem [resolvable:$true] %s2561_s23 }
  0x17   : > { %v596_v1 = vld [vmem:[%s4047_s2 + $0x78] sm:$0xff]  ;;  %v3055_v3 = vmov 0   ;;  %v456_v4 = vld [vmem:[%s4064_s1 + $0x70] sm:$0xff]  ;;  %v455_v5 = vld [vmem:[%s4064_s1 + $0x68] sm:$0xff]  ;;  %v3056_v46 = vmov 0.0   ;;  %v539_v59 = vlaneseq  ;;  %s4072_s17 = smov (!%p436_p10, %s2622_s17), 7 }
  0x18   : > { %v457_v2 = vld [vmem:[%s4064_s1 + $0x78] sm:$0xff]  ;;  %2672 = vset.pattern.permute.xlu1 %v3055_v3  ;;  %2671 = vset.pattern.permute.xlu0 %v3055_v3  ;;  %v595_v6 = vld [vmem:[%s4047_s2 + $0x70] sm:$0xff]  ;;  %v454_v7 = vld [vmem:[%s4064_s1 + $0x60] sm:$0xff]  ;;  %s2993_s14 = scalar_lea.vmem %s2562_s23, 32 }
  0x19   : > { %674 = vperm.xlu1 %2672, %v596_v1   ;;  %535 = vperm.xlu0 %2671, %v457_v2   ;;  %v594_v8 = vld [vmem:[%s4047_s2 + $0x68] sm:$0xff]  ;;  %v453_v9 = vld [vmem:[%s4064_s1 + $0x58] sm:$0xff]  ;;  %v593_v10 = vld [vmem:[%s4047_s2 + $0x60] sm:$0xff]  ;;  %v3358_v62 = vshrl.u32 %v539_v59, 7  ;;  %s438_s25 = scalar_lea.vmem %s4065_s0, %s4072_s17  ;;  %s2628_s17 = sshll.u32 %s3153_s12, 5  ;;  %vm2543_vm0 = vcmp.lt.s32.totalorder %v539_v59, 256 }
  0x1a   : > { %v452_v11 = vld [vmem:[%s4064_s1 + $0x50] sm:$0xff]  ;;  %v592_v12 = vld [vmem:[%s4047_s2 + $0x58] sm:$0xff]  ;;  %v451_v13 = vld [vmem:[%s4064_s1 + $0x48] sm:$0xff]  ;;  %1013 = vmatprep.mubr.f32.mxu0 %v3056_v46  ;;  %1414 = vmatprep.mubr.f32.mxu1 %v3056_v46  ;;  %p2994_p11 = scmp.ne.s32.totalorder %s2562_s23, %s2993_s14  ;;  %s3058_s0 = smov [#allocation3]  }
  0x1b   : > { %v591_v14 = vld [vmem:[%s4047_s2 + $0x50] sm:$0xff]  ;;  %v450_v15 = vld [vmem:[%s4064_s1 + $0x40] sm:$0xff]  ;;  %v590_v16 = vld [vmem:[%s4047_s2 + $0x48] sm:$0xff]  ;;  %v541_v1 = vsub.s32 0, %v3358_v62  ;;  %v545_v2 = vsub.s32 1, %v3358_v62  ;;  %s2997_s12 = sshll.u32 %s3058_s0, 4  ;;  %s2998_s12 = int_to_ptr.vmem [resolvable:$false] %s2997_s12 }
  0x1c   : > { %v449_v17 = vld [vmem:[%s4064_s1 + $0x38] sm:$0xff]  ;;  %v589_v18 = vld [vmem:[%s4047_s2 + $0x40] sm:$0xff]  ;;  %v448_v19 = vld [vmem:[%s4064_s1 + $0x30] sm:$0xff]  ;;  %p2995_p12 = pnand %p2994_p11, %p3170_p5  ;;  %s2999_s21 = scalar_lea.vmem %s2998_s12, 64 }
  0x1d   : > { %530 = vperm.xlu0 %2671, %v456_v4   ;;  %525 = vperm.xlu1 %2672, %v455_v5   ;;  %v588_v20 = vld [vmem:[%s4047_s2 + $0x38] sm:$0xff]  ;;  %v447_v21 = vld [vmem:[%s4064_s1 + $0x28] sm:$0xff]  ;;  %v587_v22 = vld [vmem:[%s4047_s2 + $0x30] sm:$0xff]  ;;  %p3000_p0 = scmp.lt.s32.totalorder %s2562_s23, %s2998_s12  ;;  %p3001_p1 = scmp.lt.s32.totalorder %s2999_s21, %s2993_s14 }
  0x1e   : > { %v446_v23 = vld [vmem:[%s4064_s1 + $0x20] sm:$0xff]  ;;  %v586_v24 = vld [vmem:[%s4047_s2 + $0x28] sm:$0xff]  ;;  %v445_v25 = vld [vmem:[%s4064_s1 + $0x18] sm:$0xff]  ;;  %p2996_p13 = pneg %p2995_p12 }
  0x1f   : > { %v585_v26 = vld [vmem:[%s4047_s2 + $0x20] sm:$0xff]  ;;  %v444_v27 = vld [vmem:[%s4064_s1 + $0x10] sm:$0xff]  ;;  %v584_v28 = vld [vmem:[%s4047_s2 + $0x18] sm:$0xff]  ;;  %p3002_p2 = por %p3001_p1, %p3000_p0 }
  0x20   : > { %v443_v29 = vld [vmem:[%s4064_s1 + $0x8] sm:$0xff]  ;;  %v583_v30 = vld [vmem:[%s4047_s2 + $0x10] sm:$0xff]  ;;  %v442_v31 = vld [vmem:[%s4064_s1] sm:$0xff] }
  0x21   : > { %669 = vperm.xlu0 %2671, %v595_v6   ;;  %520 = vperm.xlu1 %2672, %v454_v7   ;;  %v582_v32 = vld [vmem:[%s4047_s2 + $0x8] sm:$0xff]  ;;  %v581_v33 = vld [vmem:[%s4047_s2] sm:$0xff]  ;;  %v868_v34 = vld [vmem:[%s4049_s4 + $0x78] sm:$0xff]  ;;  %p3003_p3 = pnand %p3002_p2, %p2996_p13 }
  0x22   : > { %v867_v35 = vld [vmem:[%s4049_s4 + $0x70] sm:$0xff]  ;;  %v866_v36 = vld [vmem:[%s4049_s4 + $0x68] sm:$0xff]  ;;  %v865_v37 = vld [vmem:[%s4049_s4 + $0x60] sm:$0xff] }
  0x23   : > { %v864_v38 = vld [vmem:[%s4049_s4 + $0x58] sm:$0xff]  ;;  %v863_v39 = vld [vmem:[%s4049_s4 + $0x50] sm:$0xff]  ;;  %v862_v40 = vld [vmem:[%s4049_s4 + $0x48] sm:$0xff] }
  0x24   : > { %v861_v41 = vld [vmem:[%s4049_s4 + $0x40] sm:$0xff]  ;;  %v860_v42 = vld [vmem:[%s4049_s4 + $0x38] sm:$0xff]  ;;  %v859_v43 = vld [vmem:[%s4049_s4 + $0x30] sm:$0xff] }
  0x25   : > { %664 = vperm.xlu0 %2671, %v594_v8   ;;  %515 = vperm.xlu1 %2672, %v453_v9   ;;  %v858_v44 = vld [vmem:[%s4049_s4 + $0x28] sm:$0xff]  ;;  %v857_v45 = vld [vmem:[%s4049_s4 + $0x20] sm:$0xff]  ;;  %v856_v47 = vld [vmem:[%s4049_s4 + $0x18] sm:$0xff] }
  0x26   : > { %v855_v48 = vld [vmem:[%s4049_s4 + $0x10] sm:$0xff]  ;;  %v854_v49 = vld [vmem:[%s4049_s4 + $0x8] sm:$0xff]  ;;  %v853_v50 = vld [vmem:[%s4049_s4] sm:$0xff] }
  0x27   : > { %v1269_v51 = vld [vmem:[%s4051_s6 + $0x78] sm:$0xff]  ;;  %v1268_v52 = vld [vmem:[%s4051_s6 + $0x70] sm:$0xff]  ;;  %v1267_v53 = vld [vmem:[%s4051_s6 + $0x68] sm:$0xff] }
  0x28   : > { %v1266_v54 = vld [vmem:[%s4051_s6 + $0x60] sm:$0xff]  ;;  %v1265_v55 = vld [vmem:[%s4051_s6 + $0x58] sm:$0xff]  ;;  %v1264_v56 = vld [vmem:[%s4051_s6 + $0x50] sm:$0xff] }
  0x29   : > { %659 = vperm.xlu0 %2671, %v593_v10   ;;  %510 = vperm.xlu1 %2672, %v452_v11   ;;  %v1263_v57 = vld [vmem:[%s4051_s6 + $0x48] sm:$0xff]  ;;  %v1262_v58 = vld [vmem:[%s4051_s6 + $0x40] sm:$0xff]  ;;  %v1261_v60 = vld [vmem:[%s4051_s6 + $0x38] sm:$0xff] }
  0x2a   : > { %v1260_v61 = vld [vmem:[%s4051_s6 + $0x30] sm:$0xff]  ;;  %v1259_v63 = vld [vmem:[%s4051_s6 + $0x28] sm:$0xff]  ;;  %v1258_v0 = vld [vmem:[%s4051_s6 + $0x20] sm:$0xff] }
  0x2b   : > { %v1257_v3 = vld [vmem:[%s4051_s6 + $0x18] sm:$0xff]  ;;  %v1256_v4 = vld [vmem:[%s4051_s6 + $0x10] sm:$0xff]  ;;  %v441_v5 = vld [vmem:[%s438_s25] sm:$0x3]  ;;  %s2559_s25 = scalar_lea.hbm %s4058_s13, %s2628_s17 }
  0x2c   : > { %v3379_v6 = vrot.slane %v441_v5, %v541_v1  ;;  %v3381_v7 = vrot.slane %v441_v5, %v545_v2  ;;  %v1255_v8 = vld [vmem:[%s4051_s6 + $0x8] sm:$0xff]  ;;  %v1254_v9 = vld [vmem:[%s4051_s6] sm:$0xff] }
  0x2d   : > { %654 = vperm.xlu0 %2671, %v592_v12   ;;  %505 = vperm.xlu1 %2672, %v451_v13   ;;  %v1660_v2 = vld [vmem:[%s4053_s8 + $0x28] sm:$0xff] }
  0x31   : > { %649 = vperm.xlu0 %2671, %v591_v14   ;;  %500 = vperm.xlu1 %2672, %v450_v15   ;;  %v1670_v14 = vld [vmem:[%s4053_s8 + $0x78] sm:$0xff]  ;;  %v1669_v15 = vld [vmem:[%s4053_s8 + $0x70] sm:$0xff] }
  0x35   : > { %644 = vperm.xlu0 %2671, %v590_v16   ;;  %495 = vperm.xlu1 %2672, %v449_v17  }
  0x39   : > { %639 = vperm.xlu0 %2671, %v589_v18   ;;  %490 = vperm.xlu1 %2672, %v448_v19  }
  0x3d   : > { %634 = vperm.xlu0 %2671, %v588_v20   ;;  %485 = vperm.xlu1 %2672, %v447_v21  }
  0x41   : > { %629 = vperm.xlu0 %2671, %v587_v22   ;;  %480 = vperm.xlu1 %2672, %v446_v23   ;;  %v1668_v22 = vld [vmem:[%s4053_s8 + $0x68] sm:$0xff] }
  0x45   : > { %624 = vperm.xlu0 %2671, %v586_v24   ;;  %475 = vperm.xlu1 %2672, %v445_v25   ;;  %v1667_v25 = vld [vmem:[%s4053_s8 + $0x60] sm:$0xff] }
  0x49   : > { %619 = vperm.xlu0 %2671, %v585_v26   ;;  %470 = vperm.xlu1 %2672, %v444_v27  }
  0x4d   : > { %614 = vperm.xlu0 %2671, %v584_v28   ;;  %465 = vperm.xlu1 %2672, %v443_v29  }
  0x51   : > { %609 = vperm.xlu0 %2671, %v583_v30   ;;  %460 = vperm.xlu1 %2672, %v442_v31   ;;  %v1666_v30 = vld [vmem:[%s4053_s8 + $0x58] sm:$0xff] }
  0x55   : > { %604 = vperm.xlu0 %2671, %v582_v32   ;;  %599 = vperm.xlu1 %2672, %v581_v33  }
  0x59   : > { %946 = vperm.xlu0 %2671, %v868_v34   ;;  %941 = vperm.xlu1 %2672, %v867_v35   ;;  %v1665_v35 = vld [vmem:[%s4053_s8 + $0x50] sm:$0xff] }
  0x5d   : > { %936 = vperm.xlu0 %2671, %v866_v36   ;;  %931 = vperm.xlu1 %2672, %v865_v37  }
  0x61   : > { %926 = vperm.xlu0 %2671, %v864_v38   ;;  %921 = vperm.xlu1 %2672, %v863_v39  }
  0x65   : > { %916 = vperm.xlu0 %2671, %v862_v40   ;;  %911 = vperm.xlu1 %2672, %v861_v41   ;;  %v1664_v40 = vld [vmem:[%s4053_s8 + $0x48] sm:$0xff] }
  0x69   : > { %906 = vperm.xlu0 %2671, %v860_v42   ;;  %901 = vperm.xlu1 %2672, %v859_v43  }
  0x6d   : > { %896 = vperm.xlu0 %2671, %v858_v44   ;;  %891 = vperm.xlu1 %2672, %v857_v45   ;;  %v1663_v45 = vld [vmem:[%s4053_s8 + $0x40] sm:$0xff] }
  0x71   : > { %886 = vperm.xlu0 %2671, %v856_v47   ;;  %881 = vperm.xlu1 %2672, %v855_v48  }
  0x75   : > { %876 = vperm.xlu0 %2671, %v854_v49   ;;  %871 = vperm.xlu1 %2672, %v853_v50  }
  0x79   : > { %1347 = vperm.xlu0 %2671, %v1269_v51   ;;  %1342 = vperm.xlu1 %2672, %v1268_v52   ;;  %v1662_v51 = vld [vmem:[%s4053_s8 + $0x38] sm:$0xff] }
  0x7d   : > { %1337 = vperm.xlu0 %2671, %v1267_v53   ;;  %1332 = vperm.xlu1 %2672, %v1266_v54  }
  0x81   : > { %1327 = vperm.xlu0 %2671, %v1265_v55   ;;  %1322 = vperm.xlu1 %2672, %v1264_v56   ;;  %v1661_v56 = vld [vmem:[%s4053_s8 + $0x30] sm:$0xff] }
  0x85   : > { %1317 = vperm.xlu0 %2671, %v1263_v57   ;;  %1312 = vperm.xlu1 %2672, %v1262_v58  }
  0x89   : > { %1307 = vperm.xlu0 %2671, %v1261_v60   ;;  %1302 = vperm.xlu1 %2672, %v1260_v61  }
  0x8d   : > { %1297 = vperm.xlu0 %2671, %v1259_v63   ;;  %1292 = vperm.xlu1 %2672, %v1258_v0  }
  0x91   : > { %1287 = vperm.xlu0 %2671, %v1257_v3   ;;  %1282 = vperm.xlu1 %2672, %v1256_v4  }
  0x94   : > { %v675_v10 = vpop.permute.xlu1 %674  ;;  %v536_v11 = vpop.permute.xlu0 %535 }
  0x95   : > { %v579_v12 = vmul.f32 %v3379_v6, %v536_v11  ;;  %v580_v13 = vmul.f32 %v3381_v7, %v536_v11  ;;  %1277 = vperm.xlu0 %2671, %v1255_v8   ;;  %1272 = vperm.xlu1 %2672, %v1254_v9   ;;  %v1659_v11 = vld [vmem:[%s4053_s8 + $0x20] sm:$0xff] }
  0x97   : > { %v707_v16 = vadd.f32 %v675_v10, %v579_v12  ;;  %v708_v17 = vadd.f32 %v675_v10, %v580_v13 }
  0x98   : > { %v531_v18 = vpop.permute.xlu0 %530  ;;  %v526_v19 = vpop.permute.xlu1 %525 }
  0x99   : > { %v739_v20 = vmul.f32 0.5, %v707_v16  ;;  %v740_v21 = vmul.f32 0.5, %v708_v17  ;;  %1748 = vperm.xlu0 %2671, %v1670_v14   ;;  %1743 = vperm.xlu1 %2672, %v1669_v15   ;;  %v577_v23 = vmul.f32 %v3379_v6, %v531_v18  ;;  %v578_v24 = vmul.f32 %v3381_v7, %v531_v18 }
  0x9a   : > { %v575_v31 = vmul.f32 %v3379_v6, %v526_v19  ;;  %v576_v32 = vmul.f32 %v3381_v7, %v526_v19 }
  0x9b   : > { %2673 = vtanh.f32 %v739_v20  ;;  %v1658_v20 = vld [vmem:[%s4053_s8 + $0x18] sm:$0xff] }
  0x9c   : > { %v670_v26 = vpop.permute.xlu0 %669  ;;  %v521_v27 = vpop.permute.xlu1 %520  ;;  %2675 = vtanh.f32 %v740_v21 }
  0x9d   : > { %v705_v28 = vadd.f32 %v670_v26, %v577_v23  ;;  %v706_v29 = vadd.f32 %v670_v26, %v578_v24  ;;  %1738 = vperm.xlu0 %2671, %v1668_v22   ;;  %1733 = vperm.xlu1 %2672, %v1667_v25   ;;  %v573_v41 = vmul.f32 %v3379_v6, %v521_v27  ;;  %v1657_v25 = vld [vmem:[%s4053_s8 + $0x10] sm:$0xff] }
  0x9e   : > { %v574_v42 = vmul.f32 %v3381_v7, %v521_v27 }
  0x9f   : > { %v737_v33 = vmul.f32 0.5, %v705_v28  ;;  %v738_v34 = vmul.f32 0.5, %v706_v29 }
  0xa0   : > { %v665_v36 = vpop.permute.xlu0 %664  ;;  %v516_v37 = vpop.permute.xlu1 %515 }
  0xa1   : > { %2677 = vtanh.f32 %v737_v33  ;;  %v703_v38 = vadd.f32 %v665_v36, %v575_v31  ;;  %v704_v39 = vadd.f32 %v665_v36, %v576_v32  ;;  %1728 = vperm.xlu0 %2671, %v1666_v30   ;;  %1723 = vperm.xlu1 %2672, %v1665_v35   ;;  %v571_v52 = vmul.f32 %v3379_v6, %v516_v37  ;;  %v1656_v36 = vld [vmem:[%s4053_s8 + $0x8] sm:$0xff] }
  0xa2   : > { %2679 = vtanh.f32 %v738_v34  ;;  %v572_v53 = vmul.f32 %v3381_v7, %v516_v37 }
  0xa3   : > { %v735_v43 = vmul.f32 0.5, %v703_v38  ;;  %v736_v44 = vmul.f32 0.5, %v704_v39 }
  0xa4   : > { %v660_v47 = vpop.permute.xlu0 %659  ;;  %v511_v48 = vpop.permute.xlu1 %510 }
  0xa5   : > { %2681 = vtanh.f32 %v735_v43  ;;  %v701_v49 = vadd.f32 %v660_v47, %v573_v41  ;;  %v702_v50 = vadd.f32 %v660_v47, %v574_v42  ;;  %1718 = vperm.xlu0 %2671, %v1664_v40   ;;  %1713 = vperm.xlu1 %2672, %v1663_v45   ;;  %v569_v5 = vmul.f32 %v3379_v6, %v511_v48  ;;  %v1655_v41 = vld [vmem:[%s4053_s8] sm:$0xff] }
  0xa6   : > { %2683 = vtanh.f32 %v736_v44  ;;  %v570_v8 = vmul.f32 %v3381_v7, %v511_v48 }
  0xa7   : > { %v733_v54 = vmul.f32 0.5, %v701_v49  ;;  %v734_v55 = vmul.f32 0.5, %v702_v50 }
  0xa8   : > { %v2674_v57 = vpop.eup %2673  ;;  %v655_v58 = vpop.permute.xlu0 %654 }
  0xa9   : > { %v506_v60 = vpop.permute.xlu1 %505  ;;  %v2676_v61 = vpop.eup %2675  ;;  %2685 = vtanh.f32 %v733_v54  ;;  %v699_v63 = vadd.f32 %v655_v58, %v571_v52  ;;  %v700_v0 = vadd.f32 %v655_v58, %v572_v53  ;;  %1708 = vperm.xlu0 %2671, %v1662_v51   ;;  %1703 = vperm.xlu1 %2672, %v1661_v56   ;;  %v803_v4 = vmul.f32 0.5, %v2674_v57  ;;  %v2071_v53 = vld [vmem:[%s4055_s10 + $0x78] sm:$0xff]  ;;  %v2070_v58 = vld [vmem:[%s4055_s10 + $0x70] sm:$0xff] }
  0xaa   : > { %2687 = vtanh.f32 %v734_v55  ;;  %v804_v3 = vmul.f32 0.5, %v2676_v61  ;;  %v567_v19 = vmul.f32 %v3379_v6, %v506_v60  ;;  %v568_v22 = vmul.f32 %v3381_v7, %v506_v60 }
  0xab   : > { %v731_v9 = vmul.f32 0.5, %v699_v63  ;;  %v732_v10 = vmul.f32 0.5, %v700_v0  ;;  %v835_v15 = vadd.f32 0.5, %v803_v4 }
  0xac   : > { %v650_v12 = vpop.permute.xlu0 %649  ;;  %v836_v14 = vadd.f32 0.5, %v804_v3 }
  0xad   : > { %v501_v13 = vpop.permute.xlu1 %500  ;;  %2689 = vtanh.f32 %v731_v9  ;;  %v697_v16 = vadd.f32 %v650_v12, %v569_v5  ;;  %v698_v17 = vadd.f32 %v650_v12, %v570_v8  ;;  %1698 = vperm.xlu0 %2671, %v1660_v2   ;;  %1693 = vperm.xlu1 %2672, %v1659_v11  }
  0xae   : > { %v2678_v18 = vpop.eup %2677  ;;  %2691 = vtanh.f32 %v732_v10  ;;  %949 = vmatprep.subr.mxu0 %v836_v14  ;;  %v565_v33 = vmul.f32 %v3379_v6, %v501_v13  ;;  %v566_v38 = vmul.f32 %v3381_v7, %v501_v13  ;;  %v2069_v10 = vld [vmem:[%s4055_s10 + $0x68] sm:$0xff] }
  0xaf   : > { %v2680_v21 = vpop.eup %2679  ;;  %v729_v23 = vmul.f32 0.5, %v697_v16  ;;  %v730_v24 = vmul.f32 0.5, %v698_v17  ;;  %950 = vmatpush1.msra.mxu0 %v835_v15  ;;  %v801_v26 = vmul.f32 0.5, %v2678_v18  ;;  %v2068_v15 = vld [vmem:[%s4055_s10 + $0x60] sm:$0xff] }
  0xb0   : > { %v645_v27 = vpop.permute.xlu0 %644  ;;  %v802_v29 = vmul.f32 0.5, %v2680_v21 }
  0xb1   : > { %v496_v28 = vpop.permute.xlu1 %495  ;;  %2693 = vtanh.f32 %v729_v23  ;;  %v695_v30 = vadd.f32 %v645_v27, %v567_v19  ;;  %v696_v31 = vadd.f32 %v645_v27, %v568_v22  ;;  %1688 = vperm.xlu0 %2671, %v1658_v20   ;;  %1683 = vperm.xlu1 %2672, %v1657_v25   ;;  %v833_v35 = vadd.f32 0.5, %v801_v26  ;;  %v2067_v26 = vld [vmem:[%s4055_s10 + $0x58] sm:$0xff] }
  0xb2   : > { %v2682_v32 = vpop.eup %2681  ;;  %2695 = vtanh.f32 %v730_v24  ;;  %v834_v34 = vadd.f32 0.5, %v802_v29  ;;  %v563_v50 = vmul.f32 %v3379_v6, %v496_v28  ;;  %v564_v55 = vmul.f32 %v3381_v7, %v496_v28 }
  0xb3   : > { %v2684_v37 = vpop.eup %2683  ;;  %v727_v39 = vmul.f32 0.5, %v695_v30  ;;  %v728_v40 = vmul.f32 0.5, %v696_v31  ;;  %v799_v42 = vmul.f32 0.5, %v2682_v32  ;;  %v2066_v31 = vld [vmem:[%s4055_s10 + $0x50] sm:$0xff] }
  0xb4   : > { %951 = vmatprep.subr.mxu0 %v834_v34  ;;  %v640_v43 = vpop.permute.xlu0 %639  ;;  %v800_v45 = vmul.f32 0.5, %v2684_v37 }
  0xb5   : > { %v491_v44 = vpop.permute.xlu1 %490  ;;  %2697 = vtanh.f32 %v727_v39  ;;  %v693_v47 = vadd.f32 %v640_v43, %v565_v33  ;;  %v694_v48 = vadd.f32 %v640_v43, %v566_v38  ;;  %952 = vmatpush1.msra.mxu0 %v833_v35  ;;  %1678 = vperm.xlu0 %2671, %v1656_v36   ;;  %v831_v52 = vadd.f32 0.5, %v799_v42  ;;  %v2065_v42 = vld [vmem:[%s4055_s10 + $0x48] sm:$0xff] }
  0xb6   : > { %v2686_v49 = vpop.eup %2685  ;;  %2699 = vtanh.f32 %v728_v40  ;;  %1673 = vperm.xlu1 %2672, %v1655_v41   ;;  %v832_v51 = vadd.f32 0.5, %v800_v45  ;;  %v561_v5 = vmul.f32 %v3379_v6, %v491_v44  ;;  %v562_v12 = vmul.f32 %v3381_v7, %v491_v44 }
  0xb7   : > { %v2688_v54 = vpop.eup %2687  ;;  %v725_v56 = vmul.f32 0.5, %v693_v47  ;;  %v726_v57 = vmul.f32 0.5, %v694_v48  ;;  %v797_v60 = vmul.f32 0.5, %v2686_v49  ;;  %v2064_v48 = vld [vmem:[%s4055_s10 + $0x40] sm:$0xff] }
  0xb8   : > { %953 = vmatprep.subr.mxu0 %v832_v51  ;;  %v635_v61 = vpop.permute.xlu0 %634  ;;  %v798_v0 = vmul.f32 0.5, %v2688_v54 }
  0xb9   : > { %v486_v63 = vpop.permute.xlu1 %485  ;;  %2701 = vtanh.f32 %v725_v56  ;;  %v691_v2 = vadd.f32 %v635_v61, %v563_v50  ;;  %v692_v3 = vadd.f32 %v635_v61, %v564_v55  ;;  %954 = vmatpush1.msra.mxu0 %v831_v52  ;;  %2149 = vperm.xlu0 %2671, %v2071_v53   ;;  %v829_v9 = vadd.f32 0.5, %v797_v60  ;;  %v2063_v60 = vld [vmem:[%s4055_s10 + $0x38] sm:$0xff] }
  0xba   : > { %v2690_v4 = vpop.eup %2689  ;;  %2703 = vtanh.f32 %v726_v57  ;;  %2144 = vperm.xlu1 %2672, %v2070_v58   ;;  %v830_v8 = vadd.f32 0.5, %v798_v0  ;;  %v559_v23 = vmul.f32 %v3379_v6, %v486_v63  ;;  %v560_v28 = vmul.f32 %v3381_v7, %v486_v63 }
  0xbb   : > { %v2692_v11 = vpop.eup %2691  ;;  %v723_v13 = vmul.f32 0.5, %v691_v2  ;;  %v724_v14 = vmul.f32 0.5, %v692_v3  ;;  %v795_v16 = vmul.f32 0.5, %v2690_v4  ;;  %v2062_v3 = vld [vmem:[%s4055_s10 + $0x30] sm:$0xff] }
  0xbc   : > { %955 = vmatprep.subr.mxu0 %v830_v8  ;;  %v630_v17 = vpop.permute.xlu0 %629  ;;  %v796_v19 = vmul.f32 0.5, %v2692_v11 }
  0xbd   : > { %v481_v18 = vpop.permute.xlu1 %480  ;;  %2705 = vtanh.f32 %v723_v13  ;;  %v689_v20 = vadd.f32 %v630_v17, %v561_v5  ;;  %v690_v21 = vadd.f32 %v630_v17, %v562_v12  ;;  %956 = vmatpush1.msra.mxu0 %v829_v9  ;;  %2139 = vperm.xlu0 %2671, %v2069_v10   ;;  %v827_v25 = vadd.f32 0.5, %v795_v16  ;;  %v2061_v16 = vld [vmem:[%s4055_s10 + $0x28] sm:$0xff] }
  0xbe   : > { %v2694_v22 = vpop.eup %2693  ;;  %2707 = vtanh.f32 %v724_v14  ;;  %2134 = vperm.xlu1 %2672, %v2068_v15   ;;  %v828_v24 = vadd.f32 0.5, %v796_v19  ;;  %v557_v39 = vmul.f32 %v3379_v6, %v481_v18  ;;  %v558_v44 = vmul.f32 %v3381_v7, %v481_v18 }
  0xbf   : > { %v2696_v27 = vpop.eup %2695  ;;  %v721_v29 = vmul.f32 0.5, %v689_v20  ;;  %v722_v30 = vmul.f32 0.5, %v690_v21  ;;  %v793_v32 = vmul.f32 0.5, %v2694_v22  ;;  %v2060_v21 = vld [vmem:[%s4055_s10 + $0x20] sm:$0xff] }
  0xc0   : > { %957 = vmatprep.subr.mxu0 %v828_v24  ;;  %v625_v33 = vpop.permute.xlu0 %624  ;;  %v794_v35 = vmul.f32 0.5, %v2696_v27 }
  0xc1   : > { %v476_v34 = vpop.permute.xlu1 %475  ;;  %2709 = vtanh.f32 %v721_v29  ;;  %v687_v36 = vadd.f32 %v625_v33, %v559_v23  ;;  %v688_v37 = vadd.f32 %v625_v33, %v560_v28  ;;  %958 = vmatpush1.msra.mxu0 %v827_v25  ;;  %2129 = vperm.xlu0 %2671, %v2067_v26   ;;  %v825_v41 = vadd.f32 0.5, %v793_v32  ;;  %v2059_v33 = vld [vmem:[%s4055_s10 + $0x18] sm:$0xff] }
  0xc2   : > { %v2698_v38 = vpop.eup %2697  ;;  %2711 = vtanh.f32 %v722_v30  ;;  %2124 = vperm.xlu1 %2672, %v2066_v31   ;;  %v826_v40 = vadd.f32 0.5, %v794_v35  ;;  %v555_v56 = vmul.f32 %v3379_v6, %v476_v34  ;;  %v556_v63 = vmul.f32 %v3381_v7, %v476_v34 }
  0xc3   : > { %v2700_v43 = vpop.eup %2699  ;;  %v719_v45 = vmul.f32 0.5, %v687_v36  ;;  %v720_v47 = vmul.f32 0.5, %v688_v37  ;;  %v791_v49 = vmul.f32 0.5, %v2698_v38  ;;  %v2058_v38 = vld [vmem:[%s4055_s10 + $0x10] sm:$0xff] }
  0xc4   : > { %959 = vmatprep.subr.mxu0 %v826_v40  ;;  %v620_v50 = vpop.permute.xlu0 %619  ;;  %v792_v52 = vmul.f32 0.5, %v2700_v43 }
  0xc5   : > { %v471_v51 = vpop.permute.xlu1 %470  ;;  %2713 = vtanh.f32 %v719_v45  ;;  %v685_v53 = vadd.f32 %v620_v50, %v557_v39  ;;  %v686_v54 = vadd.f32 %v620_v50, %v558_v44  ;;  %960 = vmatpush1.msra.mxu0 %v825_v41  ;;  %2119 = vperm.xlu0 %2671, %v2065_v42   ;;  %v823_v58 = vadd.f32 0.5, %v791_v49 }
  0xc6   : > { %v2702_v55 = vpop.eup %2701  ;;  %2715 = vtanh.f32 %v720_v47  ;;  %2114 = vperm.xlu1 %2672, %v2064_v48   ;;  %v824_v57 = vadd.f32 0.5, %v792_v52  ;;  %v553_v13 = vmul.f32 %v3379_v6, %v471_v51  ;;  %v554_v18 = vmul.f32 %v3381_v7, %v471_v51 }
  0xc7   : > { %v2704_v61 = vpop.eup %2703  ;;  %v717_v0 = vmul.f32 0.5, %v685_v53  ;;  %v718_v2 = vmul.f32 0.5, %v686_v54  ;;  %v789_v4 = vmul.f32 0.5, %v2702_v55  ;;  %v2056_v55 = vld [vmem:[%s4055_s10] sm:$0xff] }
  0xc8   : > { %961 = vmatprep.subr.mxu0 %v824_v57  ;;  %v615_v5 = vpop.permute.xlu0 %614  ;;  %v790_v9 = vmul.f32 0.5, %v2704_v61 }
  0xc9   : > { %v466_v8 = vpop.permute.xlu1 %465  ;;  %2717 = vtanh.f32 %v717_v0  ;;  %v683_v10 = vadd.f32 %v615_v5, %v555_v56  ;;  %v684_v11 = vadd.f32 %v615_v5, %v556_v63  ;;  %962 = vmatpush1.msra.mxu0 %v823_v58  ;;  %2109 = vperm.xlu0 %2671, %v2063_v60   ;;  %v821_v15 = vadd.f32 0.5, %v789_v4  ;;  %v2442_v0 = vld [vmem:[#allocation2] sm:$0x1] }
  0xca   : > { %v2706_v12 = vpop.eup %2705  ;;  %2719 = vtanh.f32 %v718_v2  ;;  %2104 = vperm.xlu1 %2672, %v2062_v3   ;;  %v822_v14 = vadd.f32 0.5, %v790_v9  ;;  %v551_v26 = vmul.f32 %v3379_v6, %v466_v8  ;;  %v552_v30 = vmul.f32 %v3381_v7, %v466_v8 }
  0xcb   : > { %v2708_v17 = vpop.eup %2707  ;;  %v715_v19 = vmul.f32 0.5, %v683_v10  ;;  %v716_v20 = vmul.f32 0.5, %v684_v11  ;;  %v787_v22 = vmul.f32 0.5, %v2706_v12 }
  0xcc   : > { %963 = vmatprep.subr.mxu0 %v822_v14  ;;  %v610_v23 = vpop.permute.xlu0 %609  ;;  %v788_v25 = vmul.f32 0.5, %v2708_v17 }
  0xcd   : > { %v461_v24 = vpop.permute.xlu1 %460  ;;  %2721 = vtanh.f32 %v715_v19  ;;  %v681_v27 = vadd.f32 %v610_v23, %v553_v13  ;;  %v682_v28 = vadd.f32 %v610_v23, %v554_v18  ;;  %964 = vmatpush1.msra.mxu0 %v821_v15  ;;  %2099 = vperm.xlu0 %2671, %v2061_v16   ;;  %v819_v32 = vadd.f32 0.5, %v787_v22 }
  0xce   : > { %v2710_v29 = vpop.eup %2709  ;;  %2723 = vtanh.f32 %v716_v20  ;;  %2094 = vperm.xlu1 %2672, %v2060_v21   ;;  %v820_v31 = vadd.f32 0.5, %v788_v25  ;;  %v549_v37 = vmul.f32 %v3379_v6, %v461_v24  ;;  %v550_v40 = vmul.f32 %v3381_v7, %v461_v24  ;;  %v2057_v7 = vld [vmem:[%s4055_s10 + $0x8] sm:$0xff] }
  0xcf   : > { %v2712_v34 = vpop.eup %2711  ;;  %v713_v35 = vmul.f32 0.5, %v681_v27  ;;  %v714_v36 = vmul.f32 0.5, %v682_v28  ;;  %v785_v39 = vmul.f32 0.5, %v2710_v29 }
  0xd0   : > { %965 = vmatprep.subr.mxu0 %v820_v31  ;;  %v605_v41 = vpop.permute.xlu0 %604  ;;  %v786_v43 = vmul.f32 0.5, %v2712_v34  ;;  %v838_v34 = vld [vmem:[%s4048_s3 + $0x8] sm:$0xff] }
  0xd1   : > { %v600_v42 = vpop.permute.xlu1 %599  ;;  %2725 = vtanh.f32 %v713_v35  ;;  %v679_v44 = vadd.f32 %v605_v41, %v551_v26  ;;  %v680_v45 = vadd.f32 %v605_v41, %v552_v30  ;;  %966 = vmatpush1.msra.mxu0 %v819_v32  ;;  %2089 = vperm.xlu0 %2671, %v2059_v33   ;;  %v817_v50 = vadd.f32 0.5, %v785_v39  ;;  %v837_v33 = vld [vmem:[%s4048_s3] sm:$0xff]  ;;  %v839_v35 = vld [vmem:[%s4048_s3 + $0x10] sm:$0xff] }
  0xd2   : > { %v677_v47 = vadd.f32 %v600_v42, %v549_v37  ;;  %v2714_v48 = vpop.eup %2713  ;;  %2727 = vtanh.f32 %v714_v36  ;;  %v678_v6 = vadd.f32 %v600_v42, %v550_v40  ;;  %2084 = vperm.xlu1 %2672, %v2058_v38   ;;  %v818_v49 = vadd.f32 0.5, %v786_v43  ;;  %v840_v36 = vld [vmem:[%s4048_s3 + $0x18] sm:$0xff]  ;;  %v841_v37 = vld [vmem:[%s4048_s3 + $0x20] sm:$0xff]  ;;  %v842_v38 = vld [vmem:[%s4048_s3 + $0x28] sm:$0xff] }
  0xd3   : > { %v2716_v51 = vpop.eup %2715  ;;  %v711_v52 = vmul.f32 0.5, %v679_v44  ;;  %v712_v53 = vmul.f32 0.5, %v680_v45  ;;  %v783_v56 = vmul.f32 0.5, %v2714_v48  ;;  %v843_v39 = vld [vmem:[%s4048_s3 + $0x30] sm:$0xff]  ;;  %v844_v40 = vld [vmem:[%s4048_s3 + $0x38] sm:$0xff]  ;;  %v845_v41 = vld [vmem:[%s4048_s3 + $0x40] sm:$0xff] }
  0xd4   : > { %v709_v54 = vmul.f32 0.5, %v677_v47  ;;  %v710_v57 = vmul.f32 0.5, %v678_v6  ;;  %967 = vmatprep.subr.mxu0 %v818_v49  ;;  %v784_v58 = vmul.f32 0.5, %v2716_v51  ;;  %v846_v42 = vld [vmem:[%s4048_s3 + $0x48] sm:$0xff]  ;;  %v847_v43 = vld [vmem:[%s4048_s3 + $0x50] sm:$0xff]  ;;  %v848_v44 = vld [vmem:[%s4048_s3 + $0x58] sm:$0xff] }
  0xd5   : > { %2729 = vtanh.f32 %v711_v52  ;;  %968 = vmatpush1.msra.mxu0 %v817_v50  ;;  %2079 = vperm.xlu0 %2671, %v2057_v7   ;;  %v815_v60 = vadd.f32 0.5, %v783_v56  ;;  %v849_v45 = vld [vmem:[%s4048_s3 + $0x60] sm:$0xff]  ;;  %v850_v47 = vld [vmem:[%s4048_s3 + $0x68] sm:$0xff]  ;;  %v851_v48 = vld [vmem:[%s4048_s3 + $0x70] sm:$0xff] }
  0xd6   : > { %v2718_v61 = vpop.eup %2717  ;;  %2731 = vtanh.f32 %v712_v53  ;;  %2074 = vperm.xlu1 %2672, %v2056_v55   ;;  %v816_v63 = vadd.f32 0.5, %v784_v58  ;;  %v852_v6 = vld [vmem:[%s4048_s3 + $0x78] sm:$0xff] }
  0xd7   : > { %v2720_v2 = vpop.eup %2719  ;;  %2733 = vtanh.f32 %v709_v54  ;;  %v781_v3 = vmul.f32 0.5, %v2718_v61 }
  0xd8   : > { %2735 = vtanh.f32 %v710_v57  ;;  %969 = vmatprep.subr.mxu0 %v816_v63  ;;  %v782_v4 = vmul.f32 0.5, %v2720_v2 }
  0xd9   : > { %970 = vmatpush1.msra.mxu0 %v815_v60  ;;  %2445 = vperm.xlu0 %2671, %v2442_v0   ;;  %v813_v5 = vadd.f32 0.5, %v781_v3  ;;  %v942_v3 = vpop.permute.xlu1 %941 }
  0xda   : > { %v2722_v8 = vpop.eup %2721  ;;  %v814_v9 = vadd.f32 0.5, %v782_v4 }
  0xdb   : > { %v2724_v10 = vpop.eup %2723  ;;  %v779_v11 = vmul.f32 0.5, %v2722_v8 }
  0xdc   : > { %971 = vmatprep.subr.mxu0 %v814_v9  ;;  %v780_v12 = vmul.f32 0.5, %v2724_v10 }
  0xdd   : > { %972 = vmatpush1.msra.mxu0 %v813_v5  ;;  %v811_v13 = vadd.f32 0.5, %v779_v11  ;;  %v947_v5 = vpop.permute.xlu0 %946  ;;  %v932_v10 = vpop.permute.xlu1 %931 }
  0xde   : > { %v2726_v14 = vpop.eup %2725  ;;  %v812_v15 = vadd.f32 0.5, %v780_v12 }
  0xdf   : > { %v2728_v16 = vpop.eup %2727  ;;  %v777_v17 = vmul.f32 0.5, %v2726_v14 }
  0xe0   : > { %973 = vmatprep.subr.mxu0 %v812_v15  ;;  %v778_v18 = vmul.f32 0.5, %v2728_v16 }
  0xe1   : > { %974 = vmatpush1.msra.mxu0 %v811_v13  ;;  %v809_v19 = vadd.f32 0.5, %v777_v17  ;;  %v937_v12 = vpop.permute.xlu0 %936  ;;  %v922_v15 = vpop.permute.xlu1 %921 }
  0xe2   : > { %v2730_v20 = vpop.eup %2729  ;;  %v810_v21 = vadd.f32 0.5, %v778_v18 }
  0xe3   : > { %v2732_v22 = vpop.eup %2731  ;;  %v775_v23 = vmul.f32 0.5, %v2730_v20 }
  0xe4   : > { %v2734_v24 = vpop.eup %2733  ;;  %975 = vmatprep.subr.mxu0 %v810_v21  ;;  %v776_v25 = vmul.f32 0.5, %v2732_v22 }
  0xe5   : > { %v2736_v26 = vpop.eup %2735  ;;  %976 = vmatpush1.msra.mxu0 %v809_v19  ;;  %v807_v27 = vadd.f32 0.5, %v775_v23  ;;  %v773_v28 = vmul.f32 0.5, %v2734_v24  ;;  %v927_v17 = vpop.permute.xlu0 %926 }
  0xe6   : > { %v808_v29 = vadd.f32 0.5, %v776_v25  ;;  %v774_v30 = vmul.f32 0.5, %v2736_v26  ;;  %v912_v20 = vpop.permute.xlu1 %911 }
  0xe7   : > { %v805_v32 = vadd.f32 0.5, %v773_v28 }
  0xe8   : > { %977 = vmatprep.subr.mxu0 %v808_v29  ;;  %v806_v31 = vadd.f32 0.5, %v774_v30 }
  0xe9   : > { %978 = vmatpush1.msra.mxu0 %v807_v27  ;;  %v917_v22 = vpop.permute.xlu0 %916 }
  0xea   : > { %979 = vmatprep.subr.mxu0 %v806_v31  ;;  %v902_v26 = vpop.permute.xlu1 %901 }
  0xeb   : > { %980 = vmatpush1.msra.mxu0 %v805_v32 }
  0xec   : > { %1014 = vmatmul.mubr.f32.vlgmr.msra.gmra.mxu0 %v837_v33 }
  0xed   : > { %1019 = vmatprep.mubr.f32.mxu0 %v3056_v46  ;;  %v907_v28 = vpop.permute.xlu0 %906 }
  0xf0   : > { %1020 = vmatmul.mubr.f32.gmra.mxu0 %v838_v34 }
  0xf1   : > { %1025 = vmatprep.mubr.f32.mxu0 %v3056_v46 }
  0xf4   : > { %1026 = vmatmul.mubr.f32.gmra.mxu0 %v839_v35 }
  0xf5   : > { %1031 = vmatprep.mubr.f32.mxu0 %v3056_v46 }
  0xf8   : > { %1032 = vmatmul.mubr.f32.gmra.mxu0 %v840_v36 }
  0xf9   : > { %1037 = vmatprep.mubr.f32.mxu0 %v3056_v46 }
  0xfc   : > { %1038 = vmatmul.mubr.f32.gmra.mxu0 %v841_v37 }
  0xfd   : > { %1043 = vmatprep.mubr.f32.mxu0 %v3056_v46 }
 0x100   : > { %1044 = vmatmul.mubr.f32.gmra.mxu0 %v842_v38  ;;  %v3613_v38 = vpop.permute.xlu1 %891 }
 0x101   : > { %1049 = vmatprep.mubr.f32.mxu0 %v3056_v46 }
 0x104   : > { %1050 = vmatmul.mubr.f32.gmra.mxu0 %v843_v39 }
 0x105   : > { %1055 = vmatprep.mubr.f32.mxu0 %v3056_v46 }
 0x108   : > { %1056 = vmatmul.mubr.f32.gmra.mxu0 %v844_v40 }
 0x109   : > { %1061 = vmatprep.mubr.f32.mxu0 %v3056_v46 }
 0x10c   : > { %1062 = vmatmul.mubr.f32.gmra.mxu0 %v845_v41 }
 0x10d   : > { %1067 = vmatprep.mubr.f32.mxu0 %v3056_v46 }
 0x110   : > { %1068 = vmatmul.mubr.f32.gmra.mxu0 %v846_v42 }
 0x111   : > { %1073 = vmatprep.mubr.f32.mxu0 %v3056_v46 }
 0x114   : > { %1074 = vmatmul.mubr.f32.gmra.mxu0 %v847_v43 }
 0x115   : > { %1079 = vmatprep.mubr.f32.mxu0 %v3056_v46 }
 0x118   : > { %1080 = vmatmul.mubr.f32.gmra.mxu0 %v848_v44 }
 0x119   : > { %1085 = vmatprep.mubr.f32.mxu0 %v3056_v46 }
 0x11c   : > { %1086 = vmatmul.mubr.f32.gmra.mxu0 %v849_v45  ;;  %v897_v45 = vpop.permute.xlu0 %896 }
 0x11d   : > { %1091 = vmatprep.mubr.f32.mxu0 %v3056_v46 }
 0x120   : > { %1092 = vmatmul.mubr.f32.gmra.mxu0 %v850_v47 }
 0x121   : > { %1097 = vmatprep.mubr.f32.mxu0 %v3056_v46 }
 0x124   : > { %1098 = vmatmul.mubr.f32.gmra.mxu0 %v851_v48 }
 0x125   : > { %1103 = vmatprep.mubr.f32.mxu0 %v3056_v46 }
 0x128   : > { %1104 = vmatmul.mubr.f32.gmra.mxu0 %v852_v6 }
 0x129   : > { %1815 = vmatprep.mubr.f32.mxu0 %v3056_v46 }
 0x1ac   : > { %v3581_v49 = vpop.f32.mrf.mxu0 }
 0x1ae   : > { %v3583_v50 = vpop.f32.mrf.mxu0 }
 0x1b0   : > { %v3585_v7 = vpop.f32.mrf.mxu0 }
 0x1b2   : > { %v3587_v51 = vpop.f32.mrf.mxu0 }
 0x1b4   : > { %v3589_v52 = vpop.f32.mrf.mxu0 }
 0x1b6   : > { %v3591_v53 = vpop.f32.mrf.mxu0 }
 0x1b8   : > { %v3593_v54 = vpop.f32.mrf.mxu0 }
 0x1ba   : > { %v3595_v55 = vpop.f32.mrf.mxu0 }
 0x1bc   : > { %v3597_v56 = vpop.f32.mrf.mxu0 }
 0x1be   : > { %v3599_v57 = vpop.f32.mrf.mxu0 }
 0x1c0   : > { %v3601_v58 = vpop.f32.mrf.mxu0 }
 0x1c2   : > { %v3603_v60 = vpop.f32.mrf.mxu0 }
 0x1c4   : > { %v3605_v61 = vpop.f32.mrf.mxu0 }
 0x1c6   : > { %v3607_v63 = vpop.f32.mrf.mxu0 }
 0x1c8   : > { %v3609_v0 = vpop.f32.mrf.mxu0 }
 0x1ca   : > { %v3611_v2 = vpop.f32.mrf.mxu0 }
 0x1cc   : > { %v1063_v4 = vpop.f32.mrf.mxu0 }
 0x1ce   : > { %v1065_v8 = vpop.f32.mrf.mxu0 }
 0x1d0   : > { %v1069_v9 = vpop.f32.mrf.mxu0 }
 0x1d2   : > { %v1071_v11 = vpop.f32.mrf.mxu0 }
 0x1d4   : > { %v1075_v13 = vpop.f32.mrf.mxu0 }
 0x1d6   : > { %v1077_v14 = vpop.f32.mrf.mxu0 }
 0x1d7   : > { %v1078_v6 = vadd.f32 %v1077_v14, %v922_v15  ;;  %v1060_v14 = vadd.f32 %v3611_v2, %v907_v28  ;;  %v1048_v2 = vadd.f32 %v3603_v60, %v897_v45 }
 0x1d8   : > { %v1081_v16 = vpop.f32.mrf.mxu0 }
 0x1d9   : > { %v1082_v47 = vadd.f32 %v1081_v16, %v927_v17  ;;  %v887_v16 = vpop.permute.xlu0 %886 }
 0x1da   : > { %v1083_v18 = vpop.f32.mrf.mxu0 }
 0x1db   : > { %v1084_v42 = vadd.f32 %v1083_v18, %v927_v17  ;;  %v1132_v18 = vmul.f32 0.5, %v1082_v47  ;;  %v1064_v17 = vadd.f32 %v1063_v4, %v912_v20 }
 0x1dc   : > { %v1087_v19 = vpop.f32.mrf.mxu0 }
 0x1dd   : > { %v1088_v39 = vadd.f32 %v1087_v19, %v932_v10  ;;  %v1070_v19 = vadd.f32 %v1069_v9, %v917_v22 }
 0x1de   : > { %v1089_v21 = vpop.f32.mrf.mxu0 }
 0x1df   : > { %v1090_v35 = vadd.f32 %v1089_v21, %v932_v10  ;;  %v1076_v21 = vadd.f32 %v1075_v13, %v922_v15  ;;  %v882_v10 = vpop.permute.xlu1 %881  ;;  %v1058_v13 = vadd.f32 %v3609_v0, %v907_v28  ;;  %v1054_v15 = vadd.f32 %v3607_v63, %v902_v26  ;;  %v877_v0 = vpop.permute.xlu0 %876 }
 0x1e0   : > { %v1093_v23 = vpop.f32.mrf.mxu0  ;;  %v1046_v63 = vadd.f32 %v3601_v58, %v897_v45  ;;  %v1030_v58 = vadd.f32 %v3591_v53, %v882_v10  ;;  %v1028_v45 = vadd.f32 %v3589_v52, %v882_v10 }
 0x1e1   : > { %v1094_v33 = vadd.f32 %v1093_v23, %v937_v12  ;;  %v1134_v23 = vmul.f32 0.5, %v1088_v39  ;;  %v1036_v39 = vadd.f32 %v3595_v55, %v887_v16 }
 0x1e2   : > { %v1095_v24 = vpop.f32.mrf.mxu0  ;;  %v1114_v10 = vmul.f32 0.5, %v1028_v45 }
 0x1e3   : > { %v1096_v25 = vadd.f32 %v1095_v24, %v937_v12  ;;  %v1136_v48 = vmul.f32 0.5, %v1094_v33  ;;  %v1072_v24 = vadd.f32 %v1071_v11, %v917_v22  ;;  %v1128_v11 = vmul.f32 0.5, %v1070_v19  ;;  %v872_v22 = vpop.permute.xlu1 %871 }
 0x1e4   : > { %v1099_v27 = vpop.f32.mrf.mxu0  ;;  %v3620_v4 = vadd.f32 %v3581_v49, %v872_v22  ;;  %v3624_v28 = vadd.f32 %v3583_v50, %v872_v22  ;;  %v1124_v33 = vmul.f32 0.5, %v1058_v13  ;;  %v1042_v49 = vadd.f32 %v3599_v57, %v3613_v38 }
 0x1e5   : > { %v1100_v29 = vadd.f32 %v1099_v27, %v942_v3  ;;  %v1137_v31 = vmul.f32 0.5, %v1096_v25  ;;  %v1133_v25 = vmul.f32 0.5, %v1084_v42  ;;  %v1066_v27 = vadd.f32 %v1065_v8, %v912_v20 }
 0x1e6   : > { %v1101_v30 = vpop.f32.mrf.mxu0  ;;  %v1052_v8 = vadd.f32 %v3605_v61, %v902_v26  ;;  %v1125_v20 = vmul.f32 0.5, %v1060_v14  ;;  %v1022_v61 = vadd.f32 %v3585_v7, %v877_v0  ;;  %v1123_v26 = vmul.f32 0.5, %v1054_v15 }
 0x1e7   : > { %v1102_v32 = vadd.f32 %v1101_v30, %v942_v3  ;;  %v1138_v40 = vmul.f32 0.5, %v1100_v29  ;;  %2737 = vtanh.f32 %v1137_v31  ;;  %v1135_v3 = vmul.f32 0.5, %v1090_v35 }
 0x1e8   : > { %v1105_v34 = vpop.f32.mrf.mxu0  ;;  %v1130_v29 = vmul.f32 0.5, %v1076_v21  ;;  %v1129_v30 = vmul.f32 0.5, %v1072_v24  ;;  %v1127_v9 = vmul.f32 0.5, %v1066_v27  ;;  %v1126_v31 = vmul.f32 0.5, %v1064_v17 }
 0x1e9   : > { %v1139_v36 = vmul.f32 0.5, %v1102_v32  ;;  %v1106_v37 = vadd.f32 %v1105_v34, %v947_v5  ;;  %v1024_v35 = vadd.f32 %v3587_v51, %v877_v0  ;;  %v1122_v50 = vmul.f32 0.5, %v1052_v8 }
 0x1ea   : > { %v1107_v41 = vpop.f32.mrf.mxu0  ;;  %v1034_v57 = vadd.f32 %v3593_v54, %v887_v16  ;;  %v1119_v51 = vmul.f32 0.5, %v1042_v49  ;;  %v1112_v13 = vmul.f32 0.5, %v1022_v61  ;;  %v1111_v22 = vmul.f32 0.5, %v3624_v28 }
 0x1eb   : > { %v1140_v43 = vmul.f32 0.5, %v1106_v37  ;;  %v1108_v44 = vadd.f32 %v1107_v41, %v947_v5  ;;  %2739 = vtanh.f32 %v1139_v36  ;;  %v1131_v5 = vmul.f32 0.5, %v1078_v6 }
 0x1ec   : > { %v1040_v36 = vadd.f32 %v3597_v56, %v3613_v38  ;;  %v1120_v41 = vmul.f32 0.5, %v1046_v63  ;;  %v1113_v17 = vmul.f32 0.5, %v1024_v35 }
 0x1ed   : > { %2741 = vtanh.f32 %v1140_v43  ;;  %v1141_v12 = vmul.f32 0.5, %v1108_v44 }
 0x1ee   : > { %2743 = vtanh.f32 %v1138_v40  ;;  %v1121_v40 = vmul.f32 0.5, %v1048_v2  ;;  %v1118_v47 = vmul.f32 0.5, %v1040_v36 }
 0x1ef   : > { %2745 = vtanh.f32 %v1141_v12  ;;  %v1116_v12 = vmul.f32 0.5, %v1034_v57 }
 0x1f0   : > { %2747 = vtanh.f32 %v1136_v48  ;;  %v1117_v48 = vmul.f32 0.5, %v1036_v39 }
 0x1f1   : > { %2749 = vtanh.f32 %v1135_v3 }
 0x1f2   : > { %2751 = vtanh.f32 %v1134_v23 }
 0x1f3   : > { %2753 = vtanh.f32 %v1133_v25  ;;  %v1115_v25 = vmul.f32 0.5, %v1030_v58 }
 0x1f4   : > { %2755 = vtanh.f32 %v1132_v18  ;;  %v2738_v32 = vpop.eup %2737 }
 0x1f5   : > { %2757 = vtanh.f32 %v1131_v5  ;;  %v1201_v3 = vmul.f32 0.5, %v2738_v32 }
 0x1f6   : > { %2759 = vtanh.f32 %v1130_v29 }
 0x1f7   : > { %2761 = vtanh.f32 %v1129_v30  ;;  %v1233_v29 = vadd.f32 0.5, %v1201_v3 }
 0x1f8   : > { %2763 = vtanh.f32 %v1128_v11  ;;  %v2740_v34 = vpop.eup %2739 }
 0x1f9   : > { %2765 = vtanh.f32 %v1127_v9  ;;  %v1203_v56 = vmul.f32 0.5, %v2740_v34 }
 0x1fa   : > { %v2742_v60 = vpop.eup %2741  ;;  %2767 = vtanh.f32 %v1126_v31 }
 0x1fb   : > { %v2744_v37 = vpop.eup %2743  ;;  %2769 = vtanh.f32 %v1125_v20  ;;  %v1204_v42 = vmul.f32 0.5, %v2742_v60  ;;  %v1235_v19 = vadd.f32 0.5, %v1203_v56  ;;  %v1110_v20 = vmul.f32 0.5, %v3620_v4 }
 0x1fc   : > { %v2746_v7 = vpop.eup %2745  ;;  %2771 = vtanh.f32 %v1124_v33  ;;  %v1202_v53 = vmul.f32 0.5, %v2744_v37 }
 0x1fd   : > { %v2748_v43 = vpop.eup %2747  ;;  %2773 = vtanh.f32 %v1123_v26  ;;  %v1205_v44 = vmul.f32 0.5, %v2746_v7  ;;  %v1236_v21 = vadd.f32 0.5, %v1204_v42 }
 0x1fe   : > { %v2750_v38 = vpop.eup %2749  ;;  %2775 = vtanh.f32 %v1122_v50  ;;  %v1200_v23 = vmul.f32 0.5, %v2748_v43  ;;  %v1234_v27 = vadd.f32 0.5, %v1202_v53 }
 0x1ff   : > { %v2752_v55 = vpop.eup %2751  ;;  %2777 = vtanh.f32 %v1121_v40  ;;  %v1237_v6 = vadd.f32 0.5, %v1205_v44  ;;  %v1199_v18 = vmul.f32 0.5, %v2750_v38 }
 0x200   : > { %v2754_v54 = vpop.eup %2753  ;;  %2779 = vtanh.f32 %v1120_v41  ;;  %v1198_v5 = vmul.f32 0.5, %v2752_v55  ;;  %v1232_v11 = vadd.f32 0.5, %v1200_v23 }
 0x201   : > { %v2756_v24 = vpop.eup %2755  ;;  %2781 = vtanh.f32 %v1119_v51  ;;  %1350 = vmatprep.subr.mxu1 %v1237_v6  ;;  %v1197_v14 = vmul.f32 0.5, %v2754_v54  ;;  %v1231_v8 = vadd.f32 0.5, %v1199_v18 }
 0x202   : > { %v2758_v52 = vpop.eup %2757  ;;  %2783 = vtanh.f32 %v1118_v47  ;;  %1351 = vmatpush1.msra.mxu1 %v1236_v21  ;;  %v1196_v15 = vmul.f32 0.5, %v2756_v24  ;;  %v1230_v32 = vadd.f32 0.5, %v1198_v5 }
 0x203   : > { %v2760_v16 = vpop.eup %2759  ;;  %2785 = vtanh.f32 %v1117_v48  ;;  %1352 = vmatprep.subr.mxu1 %v1235_v19  ;;  %v1195_v31 = vmul.f32 0.5, %v2758_v52  ;;  %v1229_v33 = vadd.f32 0.5, %v1197_v14 }
 0x204   : > { %v2762_v30 = vpop.eup %2761  ;;  %2787 = vtanh.f32 %v1116_v12  ;;  %1353 = vmatpush1.msra.mxu1 %v1234_v27  ;;  %v1194_v0 = vmul.f32 0.5, %v2760_v16  ;;  %v1228_v28 = vadd.f32 0.5, %v1196_v15 }
 0x205   : > { %v2764_v9 = vpop.eup %2763  ;;  %2789 = vtanh.f32 %v1115_v25  ;;  %1354 = vmatprep.subr.mxu1 %v1233_v29  ;;  %v1193_v34 = vmul.f32 0.5, %v2762_v30  ;;  %v1227_v60 = vadd.f32 0.5, %v1195_v31 }
 0x206   : > { %v2766_v2 = vpop.eup %2765  ;;  %2791 = vtanh.f32 %v1114_v10  ;;  %1355 = vmatpush1.msra.mxu1 %v1232_v11  ;;  %v1192_v49 = vmul.f32 0.5, %v2764_v9  ;;  %v1226_v36 = vadd.f32 0.5, %v1194_v0 }
 0x207   : > { %v2768_v63 = vpop.eup %2767  ;;  %2793 = vtanh.f32 %v1113_v17  ;;  %1356 = vmatprep.subr.mxu1 %v1231_v8  ;;  %v1191_v35 = vmul.f32 0.5, %v2766_v2  ;;  %v1225_v58 = vadd.f32 0.5, %v1193_v34  ;;  %v1239_v34 = vld [vmem:[%s4050_s5 + $0x8] sm:$0xff] }
 0x208   : > { %v2770_v61 = vpop.eup %2769  ;;  %2795 = vtanh.f32 %v1112_v13  ;;  %1357 = vmatpush1.msra.mxu1 %v1230_v32  ;;  %v1190_v50 = vmul.f32 0.5, %v2768_v63  ;;  %v1224_v7 = vadd.f32 0.5, %v1192_v49  ;;  %v1242_v49 = vld [vmem:[%s4050_s5 + $0x20] sm:$0xff] }
 0x209   : > { %v2772_v26 = vpop.eup %2771  ;;  %2797 = vtanh.f32 %v1111_v22  ;;  %1358 = vmatprep.subr.mxu1 %v1229_v33  ;;  %v1189_v39 = vmul.f32 0.5, %v2770_v61  ;;  %v1223_v42 = vadd.f32 0.5, %v1191_v35  ;;  %v1238_v33 = vld [vmem:[%s4050_s5] sm:$0xff]  ;;  %v1240_v61 = vld [vmem:[%s4050_s5 + $0x10] sm:$0xff]  ;;  %v1245_v35 = vld [vmem:[%s4050_s5 + $0x38] sm:$0xff] }
 0x20a   : > { %v2774_v4 = vpop.eup %2773  ;;  %2799 = vtanh.f32 %v1110_v20  ;;  %1359 = vmatpush1.msra.mxu1 %v1228_v28  ;;  %v1188_v57 = vmul.f32 0.5, %v2772_v26  ;;  %v1222_v44 = vadd.f32 0.5, %v1190_v50  ;;  %v1241_v28 = vld [vmem:[%s4050_s5 + $0x18] sm:$0xff]  ;;  %v1243_v26 = vld [vmem:[%s4050_s5 + $0x28] sm:$0xff]  ;;  %v1248_v50 = vld [vmem:[%s4050_s5 + $0x50] sm:$0xff] }
 0x20b   : > { %v2776_v37 = vpop.eup %2775  ;;  %1360 = vmatprep.subr.mxu1 %v1227_v60  ;;  %v1187_v43 = vmul.f32 0.5, %v2774_v4  ;;  %v1221_v45 = vadd.f32 0.5, %v1189_v39  ;;  %v1244_v60 = vld [vmem:[%s4050_s5 + $0x30] sm:$0xff]  ;;  %v1246_v4 = vld [vmem:[%s4050_s5 + $0x40] sm:$0xff]  ;;  %v1251_v39 = vld [vmem:[%s4050_s5 + $0x68] sm:$0xff] }
 0x20c   : > { %v2778_v40 = vpop.eup %2777  ;;  %1361 = vmatpush1.msra.mxu1 %v1226_v36  ;;  %v1186_v56 = vmul.f32 0.5, %v2776_v37  ;;  %v1220_v55 = vadd.f32 0.5, %v1188_v57  ;;  %v1247_v36 = vld [vmem:[%s4050_s5 + $0x48] sm:$0xff]  ;;  %v1249_v37 = vld [vmem:[%s4050_s5 + $0x58] sm:$0xff] }
 0x20d   : > { %v2780_v41 = vpop.eup %2779  ;;  %1362 = vmatprep.subr.mxu1 %v1225_v58  ;;  %v1185_v47 = vmul.f32 0.5, %v2778_v40  ;;  %v1219_v3 = vadd.f32 0.5, %v1187_v43  ;;  %v1250_v58 = vld [vmem:[%s4050_s5 + $0x60] sm:$0xff]  ;;  %v1252_v40 = vld [vmem:[%s4050_s5 + $0x70] sm:$0xff] }
 0x20e   : > { %v2782_v51 = vpop.eup %2781  ;;  %1363 = vmatpush1.msra.mxu1 %v1224_v7  ;;  %v1184_v48 = vmul.f32 0.5, %v2780_v41  ;;  %v1218_v21 = vadd.f32 0.5, %v1186_v56  ;;  %v1253_v7 = vld [vmem:[%s4050_s5 + $0x78] sm:$0xff] }
 0x20f   : > { %v2784_v38 = vpop.eup %2783  ;;  %1364 = vmatprep.subr.mxu1 %v1223_v42  ;;  %v1183_v54 = vmul.f32 0.5, %v2782_v51  ;;  %v1217_v25 = vadd.f32 0.5, %v1185_v47 }
 0x210   : > { %v2786_v53 = vpop.eup %2785  ;;  %1365 = vmatpush1.msra.mxu1 %v1222_v44  ;;  %v1182_v23 = vmul.f32 0.5, %v2784_v38  ;;  %v1216_v52 = vadd.f32 0.5, %v1184_v48 }
 0x211   : > { %v2788_v6 = vpop.eup %2787  ;;  %1366 = vmatprep.subr.mxu1 %v1221_v45  ;;  %v1181_v19 = vmul.f32 0.5, %v2786_v53  ;;  %v1215_v5 = vadd.f32 0.5, %v1183_v54 }
 0x212   : > { %v2790_v12 = vpop.eup %2789  ;;  %1367 = vmatpush1.msra.mxu1 %v1220_v55  ;;  %v1180_v10 = vmul.f32 0.5, %v2788_v6  ;;  %v1214_v29 = vadd.f32 0.5, %v1182_v23  ;;  %v1348_v23 = vpop.permute.xlu0 %1347 }
 0x213   : > { %v2792_v24 = vpop.eup %2791  ;;  %1368 = vmatprep.subr.mxu1 %v1219_v3  ;;  %v1179_v16 = vmul.f32 0.5, %v2790_v12  ;;  %v1213_v13 = vadd.f32 0.5, %v1181_v19  ;;  %v1343_v12 = vpop.permute.xlu1 %1342 }
 0x214   : > { %v2794_v18 = vpop.eup %2793  ;;  %1369 = vmatpush1.msra.mxu1 %v1218_v21  ;;  %v1178_v14 = vmul.f32 0.5, %v2792_v24  ;;  %v1212_v15 = vadd.f32 0.5, %v1180_v10 }
 0x215   : > { %v2796_v27 = vpop.eup %2795  ;;  %1370 = vmatprep.subr.mxu1 %v1217_v25  ;;  %v1177_v11 = vmul.f32 0.5, %v2794_v18  ;;  %v1211_v22 = vadd.f32 0.5, %v1179_v16 }
 0x216   : > { %v2798_v17 = vpop.eup %2797  ;;  %1371 = vmatpush1.msra.mxu1 %v1216_v52  ;;  %v1176_v9 = vmul.f32 0.5, %v2796_v27  ;;  %v1210_v31 = vadd.f32 0.5, %v1178_v14  ;;  %v1338_v52 = vpop.permute.xlu0 %1337 }
 0x217   : > { %v2800_v30 = vpop.eup %2799  ;;  %1372 = vmatprep.subr.mxu1 %v1215_v5  ;;  %v1175_v8 = vmul.f32 0.5, %v2798_v17  ;;  %v1209_v20 = vadd.f32 0.5, %v1177_v11  ;;  %v1333_v19 = vpop.permute.xlu1 %1332 }
 0x218   : > { %1373 = vmatpush1.msra.mxu1 %v1214_v29  ;;  %v1174_v2 = vmul.f32 0.5, %v2800_v30  ;;  %v1208_v32 = vadd.f32 0.5, %v1176_v9 }
 0x219   : > { %1374 = vmatprep.subr.mxu1 %v1213_v13  ;;  %v1207_v0 = vadd.f32 0.5, %v1175_v8 }
 0x21a   : > { %1375 = vmatpush1.msra.mxu1 %v1212_v15  ;;  %v1206_v63 = vadd.f32 0.5, %v1174_v2  ;;  %v1328_v17 = vpop.permute.xlu0 %1327 }
 0x21b   : > { %1376 = vmatprep.subr.mxu1 %v1211_v22  ;;  %v1323_v5 = vpop.permute.xlu1 %1322 }
 0x21c   : > { %1377 = vmatpush1.msra.mxu1 %v1210_v31 }
 0x21d   : > { %1378 = vmatprep.subr.mxu1 %v1209_v20 }
 0x21e   : > { %1379 = vmatpush1.msra.mxu1 %v1208_v32  ;;  %v1318_v11 = vpop.permute.xlu0 %1317 }
 0x21f   : > { %1380 = vmatprep.subr.mxu1 %v1207_v0  ;;  %v1313_v30 = vpop.permute.xlu1 %1312 }
 0x220   : > { %1381 = vmatpush1.msra.mxu1 %v1206_v63 }
 0x221   : > { %1415 = vmatmul.mubr.f32.vlgmr.msra.gmra.mxu1 %v1238_v33 }
 0x222   : > { %1420 = vmatprep.mubr.f32.mxu1 %v3056_v46  ;;  %v1308_v2 = vpop.permute.xlu0 %1307 }
 0x223   : > { %v1303_v8 = vpop.permute.xlu1 %1302 }
 0x225   : > { %1421 = vmatmul.mubr.f32.gmra.mxu1 %v1239_v34 }
 0x226   : > { %1426 = vmatprep.mubr.f32.mxu1 %v3056_v46 }
 0x229   : > { %1427 = vmatmul.mubr.f32.gmra.mxu1 %v1240_v61 }
 0x22a   : > { %1432 = vmatprep.mubr.f32.mxu1 %v3056_v46 }
 0x22d   : > { %1433 = vmatmul.mubr.f32.gmra.mxu1 %v1241_v28 }
 0x22e   : > { %1438 = vmatprep.mubr.f32.mxu1 %v3056_v46 }
 0x231   : > { %1439 = vmatmul.mubr.f32.gmra.mxu1 %v1242_v49 }
 0x232   : > { %1444 = vmatprep.mubr.f32.mxu1 %v3056_v46 }
 0x235   : > { %1445 = vmatmul.mubr.f32.gmra.mxu1 %v1243_v26  ;;  %v3735_v26 = vpop.permute.xlu1 %1292 }
 0x236   : > { %1450 = vmatprep.mubr.f32.mxu1 %v3056_v46 }
 0x239   : > { %1451 = vmatmul.mubr.f32.gmra.mxu1 %v1244_v60 }
 0x23a   : > { %1456 = vmatprep.mubr.f32.mxu1 %v3056_v46 }
 0x23d   : > { %1457 = vmatmul.mubr.f32.gmra.mxu1 %v1245_v35 }
 0x23e   : > { %1462 = vmatprep.mubr.f32.mxu1 %v3056_v46 }
 0x241   : > { %1463 = vmatmul.mubr.f32.gmra.mxu1 %v1246_v4 }
 0x242   : > { %1468 = vmatprep.mubr.f32.mxu1 %v3056_v46 }
 0x245   : > { %1469 = vmatmul.mubr.f32.gmra.mxu1 %v1247_v36 }
 0x246   : > { %1474 = vmatprep.mubr.f32.mxu1 %v3056_v46 }
 0x249   : > { %1475 = vmatmul.mubr.f32.gmra.mxu1 %v1248_v50 }
 0x24a   : > { %1480 = vmatprep.mubr.f32.mxu1 %v3056_v46 }
 0x24d   : > { %1481 = vmatmul.mubr.f32.gmra.mxu1 %v1249_v37 }
 0x24e   : > { %1486 = vmatprep.mubr.f32.mxu1 %v3056_v46 }
 0x251   : > { %1487 = vmatmul.mubr.f32.gmra.mxu1 %v1250_v58  ;;  %v1298_v58 = vpop.permute.xlu0 %1297 }
 0x252   : > { %1492 = vmatprep.mubr.f32.mxu1 %v3056_v46 }
 0x255   : > { %1493 = vmatmul.mubr.f32.gmra.mxu1 %v1251_v39 }
 0x256   : > { %1498 = vmatprep.mubr.f32.mxu1 %v3056_v46 }
 0x259   : > { %1499 = vmatmul.mubr.f32.gmra.mxu1 %v1252_v40 }
 0x25a   : > { %1504 = vmatprep.mubr.f32.mxu1 %v3056_v46 }
 0x25d   : > { %1505 = vmatmul.mubr.f32.gmra.mxu1 %v1253_v7 }
 0x25e   : > { %2216 = vmatprep.mubr.f32.mxu1 %v3056_v46 }
 0x2e1   : > { %v3703_v57 = vpop.f32.mrf.mxu1 }
 0x2e3   : > { %v3705_v41 = vpop.f32.mrf.mxu1 }
 0x2e5   : > { %v3707_v42 = vpop.f32.mrf.mxu1 }
 0x2e7   : > { %v3709_v43 = vpop.f32.mrf.mxu1 }
 0x2e9   : > { %v3711_v51 = vpop.f32.mrf.mxu1 }
 0x2eb   : > { %v3713_v44 = vpop.f32.mrf.mxu1 }
 0x2ed   : > { %v3715_v56 = vpop.f32.mrf.mxu1 }
 0x2ef   : > { %v3717_v38 = vpop.f32.mrf.mxu1 }
 0x2f1   : > { %v3719_v45 = vpop.f32.mrf.mxu1 }
 0x2f3   : > { %v3721_v47 = vpop.f32.mrf.mxu1 }
 0x2f5   : > { %v3723_v53 = vpop.f32.mrf.mxu1 }
 0x2f7   : > { %v3725_v55 = vpop.f32.mrf.mxu1 }
 0x2f9   : > { %v3727_v48 = vpop.f32.mrf.mxu1 }
 0x2fb   : > { %v3729_v6 = vpop.f32.mrf.mxu1 }
 0x2fd   : > { %v3731_v3 = vpop.f32.mrf.mxu1 }
 0x2ff   : > { %v3733_v54 = vpop.f32.mrf.mxu1 }
 0x301   : > { %v1464_v21 = vpop.f32.mrf.mxu1 }
 0x303   : > { %v1466_v24 = vpop.f32.mrf.mxu1 }
 0x305   : > { %v1470_v25 = vpop.f32.mrf.mxu1 }
 0x307   : > { %v1472_v18 = vpop.f32.mrf.mxu1 }
 0x309   : > { %v1476_v10 = vpop.f32.mrf.mxu1 }
 0x30b   : > { %v1478_v27 = vpop.f32.mrf.mxu1 }
 0x30c   : > { %v1479_v7 = vadd.f32 %v1478_v27, %v1323_v5  ;;  %v1461_v27 = vadd.f32 %v3733_v54, %v1308_v2  ;;  %v1449_v54 = vadd.f32 %v3725_v55, %v1298_v58 }
 0x30d   : > { %v1482_v16 = vpop.f32.mrf.mxu1 }
 0x30e   : > { %v1483_v39 = vadd.f32 %v1482_v16, %v1328_v17  ;;  %v1288_v16 = vpop.permute.xlu0 %1287 }
 0x30f   : > { %v1484_v29 = vpop.f32.mrf.mxu1 }
 0x310   : > { %v1485_v36 = vadd.f32 %v1484_v29, %v1328_v17  ;;  %v1533_v29 = vmul.f32 0.5, %v1483_v39  ;;  %v1465_v17 = vadd.f32 %v1464_v21, %v1313_v30 }
 0x311   : > { %v1488_v14 = vpop.f32.mrf.mxu1 }
 0x312   : > { %v1489_v60 = vadd.f32 %v1488_v14, %v1333_v19  ;;  %v1471_v14 = vadd.f32 %v1470_v25, %v1318_v11 }
 0x313   : > { %v1490_v13 = vpop.f32.mrf.mxu1 }
 0x314   : > { %v1491_v61 = vadd.f32 %v1490_v13, %v1333_v19  ;;  %v1477_v13 = vadd.f32 %v1476_v10, %v1323_v5  ;;  %v1283_v19 = vpop.permute.xlu1 %1282  ;;  %v1459_v10 = vadd.f32 %v3731_v3, %v1308_v2  ;;  %v1455_v5 = vadd.f32 %v3729_v6, %v1303_v8  ;;  %v1278_v3 = vpop.permute.xlu0 %1277 }
 0x315   : > { %v1494_v15 = vpop.f32.mrf.mxu1  ;;  %v1447_v6 = vadd.f32 %v3723_v53, %v1298_v58  ;;  %v1431_v53 = vadd.f32 %v3713_v44, %v1283_v19  ;;  %v1429_v58 = vadd.f32 %v3711_v51, %v1283_v19 }
 0x316   : > { %v1495_v33 = vadd.f32 %v1494_v15, %v1338_v52  ;;  %v1535_v15 = vmul.f32 0.5, %v1489_v60  ;;  %v1437_v60 = vadd.f32 %v3717_v38, %v1288_v16 }
 0x317   : > { %v1496_v9 = vpop.f32.mrf.mxu1  ;;  %v1515_v19 = vmul.f32 0.5, %v1429_v58 }
 0x318   : > { %v1497_v22 = vadd.f32 %v1496_v9, %v1338_v52  ;;  %v1537_v40 = vmul.f32 0.5, %v1495_v33  ;;  %v1473_v9 = vadd.f32 %v1472_v18, %v1318_v11  ;;  %v1529_v18 = vmul.f32 0.5, %v1471_v14  ;;  %v1273_v11 = vpop.permute.xlu1 %1272 }
 0x319   : > { %v1500_v31 = vpop.f32.mrf.mxu1  ;;  %v3742_v21 = vadd.f32 %v3703_v57, %v1273_v11  ;;  %v3746_v2 = vadd.f32 %v3705_v41, %v1273_v11  ;;  %v1525_v33 = vmul.f32 0.5, %v1459_v10  ;;  %v1443_v57 = vadd.f32 %v3721_v47, %v3735_v26 }
 0x31a   : > { %v1501_v20 = vadd.f32 %v1500_v31, %v1343_v12  ;;  %v1538_v0 = vmul.f32 0.5, %v1497_v22  ;;  %v1534_v22 = vmul.f32 0.5, %v1485_v36  ;;  %v1467_v31 = vadd.f32 %v1466_v24, %v1313_v30 }
 0x31b   : > { %v1502_v32 = vpop.f32.mrf.mxu1  ;;  %v1453_v24 = vadd.f32 %v3727_v48, %v1303_v8  ;;  %v1526_v30 = vmul.f32 0.5, %v1461_v27  ;;  %v1423_v48 = vadd.f32 %v3707_v42, %v1278_v3  ;;  %v1524_v8 = vmul.f32 0.5, %v1455_v5 }
 0x31c   : > { %v1503_v63 = vadd.f32 %v1502_v32, %v1343_v12  ;;  %v1539_v35 = vmul.f32 0.5, %v1501_v20  ;;  %2801 = vtanh.f32 %v1538_v0  ;;  %v1536_v12 = vmul.f32 0.5, %v1491_v61 }
 0x31d   : > { %v1506_v34 = vpop.f32.mrf.mxu1  ;;  %v1531_v20 = vmul.f32 0.5, %v1477_v13  ;;  %v1530_v32 = vmul.f32 0.5, %v1473_v9  ;;  %v1528_v25 = vmul.f32 0.5, %v1467_v31  ;;  %v1527_v0 = vmul.f32 0.5, %v1465_v17 }
 0x31e   : > { %v1540_v28 = vmul.f32 0.5, %v1503_v63  ;;  %v1507_v49 = vadd.f32 %v1506_v34, %v1348_v23  ;;  %v1425_v61 = vadd.f32 %v3709_v43, %v1278_v3  ;;  %v1523_v41 = vmul.f32 0.5, %v1453_v24 }
 0x31f   : > { %v1508_v4 = vpop.f32.mrf.mxu1  ;;  %v1435_v47 = vadd.f32 %v3715_v56, %v1288_v16  ;;  %v1520_v43 = vmul.f32 0.5, %v1443_v57  ;;  %v1513_v10 = vmul.f32 0.5, %v1423_v48  ;;  %v1512_v11 = vmul.f32 0.5, %v3746_v2 }
 0x320   : > { %v1541_v50 = vmul.f32 0.5, %v1507_v49  ;;  %v1509_v37 = vadd.f32 %v1508_v4, %v1348_v23  ;;  %2803 = vtanh.f32 %v1540_v28  ;;  %v1532_v23 = vmul.f32 0.5, %v1479_v7 }
 0x321   : > { %v1441_v28 = vadd.f32 %v3719_v45, %v3735_v26  ;;  %v1521_v4 = vmul.f32 0.5, %v1447_v6  ;;  %v1514_v17 = vmul.f32 0.5, %v1425_v61 }
 0x322   : > { %2805 = vtanh.f32 %v1541_v50  ;;  %v1542_v52 = vmul.f32 0.5, %v1509_v37 }
 0x323   : > { %2807 = vtanh.f32 %v1539_v35  ;;  %v1522_v35 = vmul.f32 0.5, %v1449_v54  ;;  %v1519_v39 = vmul.f32 0.5, %v1441_v28 }
 0x324   : > { %2809 = vtanh.f32 %v1542_v52  ;;  %v1517_v52 = vmul.f32 0.5, %v1435_v47 }
 0x325   : > { %2811 = vtanh.f32 %v1537_v40  ;;  %v1518_v40 = vmul.f32 0.5, %v1437_v60 }
 0x326   : > { %2813 = vtanh.f32 %v1536_v12 }
 0x327   : > { %2815 = vtanh.f32 %v1535_v15 }
 0x328   : > { %2817 = vtanh.f32 %v1534_v22  ;;  %v1516_v22 = vmul.f32 0.5, %v1431_v53 }
 0x329   : > { %2819 = vtanh.f32 %v1533_v29  ;;  %v2802_v63 = vpop.eup %2801 }
 0x32a   : > { %2821 = vtanh.f32 %v1532_v23  ;;  %v1602_v12 = vmul.f32 0.5, %v2802_v63 }
 0x32b   : > { %2823 = vtanh.f32 %v1531_v20 }
 0x32c   : > { %2825 = vtanh.f32 %v1530_v32  ;;  %v1634_v20 = vadd.f32 0.5, %v1602_v12 }
 0x32d   : > { %2827 = vtanh.f32 %v1529_v18  ;;  %v2804_v34 = vpop.eup %2803 }
 0x32e   : > { %2829 = vtanh.f32 %v1528_v25  ;;  %v1604_v45 = vmul.f32 0.5, %v2804_v34 }
 0x32f   : > { %v2806_v55 = vpop.eup %2805  ;;  %2831 = vtanh.f32 %v1527_v0 }
 0x330   : > { %v2808_v49 = vpop.eup %2807  ;;  %2833 = vtanh.f32 %v1526_v30  ;;  %v1605_v36 = vmul.f32 0.5, %v2806_v55  ;;  %v1636_v14 = vadd.f32 0.5, %v1604_v45  ;;  %v1511_v30 = vmul.f32 0.5, %v3742_v21 }
 0x331   : > { %v2810_v42 = vpop.eup %2809  ;;  %2835 = vtanh.f32 %v1525_v33  ;;  %v1603_v44 = vmul.f32 0.5, %v2808_v49 }
 0x332   : > { %v2812_v50 = vpop.eup %2811  ;;  %2837 = vtanh.f32 %v1524_v8  ;;  %v1606_v37 = vmul.f32 0.5, %v2810_v42  ;;  %v1637_v15 = vadd.f32 0.5, %v1605_v36 }
 0x333   : > { %v2814_v26 = vpop.eup %2813  ;;  %2839 = vtanh.f32 %v1523_v41  ;;  %v1601_v13 = vmul.f32 0.5, %v2812_v50  ;;  %v1635_v23 = vadd.f32 0.5, %v1603_v44 }
 0x334   : > { %v2816_v38 = vpop.eup %2815  ;;  %2841 = vtanh.f32 %v1522_v35  ;;  %v1638_v7 = vadd.f32 0.5, %v1606_v37  ;;  %v1600_v29 = vmul.f32 0.5, %v2814_v26 }
 0x335   : > { %v2818_v56 = vpop.eup %2817  ;;  %2843 = vtanh.f32 %v1521_v4  ;;  %v1599_v31 = vmul.f32 0.5, %v2816_v38  ;;  %v1633_v5 = vadd.f32 0.5, %v1601_v13 }
 0x336   : > { %v2820_v9 = vpop.eup %2819  ;;  %2845 = vtanh.f32 %v1520_v43  ;;  %1751 = vmatprep.subr.mxu0 %v1638_v7  ;;  %v1598_v27 = vmul.f32 0.5, %v2818_v56  ;;  %v1632_v24 = vadd.f32 0.5, %v1600_v29 }
 0x337   : > { %v2822_v51 = vpop.eup %2821  ;;  %2847 = vtanh.f32 %v1519_v39  ;;  %1752 = vmatpush1.msra.mxu0 %v1637_v15  ;;  %v1597_v18 = vmul.f32 0.5, %v2820_v9  ;;  %v1631_v3 = vadd.f32 0.5, %v1599_v31 }
 0x338   : > { %v2824_v16 = vpop.eup %2823  ;;  %2849 = vtanh.f32 %v1518_v40  ;;  %1753 = vmatprep.subr.mxu0 %v1636_v14  ;;  %v1596_v0 = vmul.f32 0.5, %v2822_v51  ;;  %v1630_v33 = vadd.f32 0.5, %v1598_v27 }
 0x339   : > { %v2826_v32 = vpop.eup %2825  ;;  %2851 = vtanh.f32 %v1517_v52  ;;  %1754 = vmatpush1.msra.mxu0 %v1635_v23  ;;  %v1595_v63 = vmul.f32 0.5, %v2824_v16  ;;  %v1629_v2 = vadd.f32 0.5, %v1597_v18 }
 0x33a   : > { %v2828_v25 = vpop.eup %2827  ;;  %2853 = vtanh.f32 %v1516_v22  ;;  %1755 = vmatprep.subr.mxu0 %v1634_v20  ;;  %v1594_v34 = vmul.f32 0.5, %v2826_v32  ;;  %v1628_v55 = vadd.f32 0.5, %v1596_v0 }
 0x33b   : > { %v2830_v54 = vpop.eup %2829  ;;  %2855 = vtanh.f32 %v1515_v19  ;;  %1756 = vmatpush1.msra.mxu0 %v1633_v5  ;;  %v1593_v57 = vmul.f32 0.5, %v2828_v25  ;;  %v1627_v41 = vadd.f32 0.5, %v1595_v63 }
 0x33c   : > { %v2832_v6 = vpop.eup %2831  ;;  %2857 = vtanh.f32 %v1514_v17  ;;  %1757 = vmatprep.subr.mxu0 %v1632_v24  ;;  %v1592_v61 = vmul.f32 0.5, %v2830_v54  ;;  %v1626_v53 = vadd.f32 0.5, %v1594_v34  ;;  %v1640_v34 = vld [vmem:[%s4052_s7 + $0x8] sm:$0xff] }
 0x33d   : > { %v2834_v48 = vpop.eup %2833  ;;  %2859 = vtanh.f32 %v1513_v10  ;;  %1758 = vmatpush1.msra.mxu0 %v1631_v3  ;;  %v1591_v28 = vmul.f32 0.5, %v2832_v6  ;;  %v1625_v47 = vadd.f32 0.5, %v1593_v57  ;;  %v1642_v57 = vld [vmem:[%s4052_s7 + $0x18] sm:$0xff] }
 0x33e   : > { %v2836_v8 = vpop.eup %2835  ;;  %2861 = vtanh.f32 %v1512_v11  ;;  %1759 = vmatprep.subr.mxu0 %v1630_v33  ;;  %v1590_v60 = vmul.f32 0.5, %v2834_v48  ;;  %v1624_v36 = vadd.f32 0.5, %v1592_v61  ;;  %v1639_v33 = vld [vmem:[%s4052_s7] sm:$0xff]  ;;  %v1641_v48 = vld [vmem:[%s4052_s7 + $0x10] sm:$0xff]  ;;  %v1646_v61 = vld [vmem:[%s4052_s7 + $0x38] sm:$0xff] }
 0x33f   : > { %v2838_v21 = vpop.eup %2837  ;;  %2863 = vtanh.f32 %v1511_v30  ;;  %1760 = vmatpush1.msra.mxu0 %v1629_v2  ;;  %v1589_v42 = vmul.f32 0.5, %v2836_v8  ;;  %v1623_v45 = vadd.f32 0.5, %v1591_v28  ;;  %v1643_v2 = vld [vmem:[%s4052_s7 + $0x20] sm:$0xff]  ;;  %v1644_v8 = vld [vmem:[%s4052_s7 + $0x28] sm:$0xff] }
 0x340   : > { %v2840_v49 = vpop.eup %2839  ;;  %1761 = vmatprep.subr.mxu0 %v1628_v55  ;;  %v1588_v50 = vmul.f32 0.5, %v2838_v21  ;;  %v1622_v58 = vadd.f32 0.5, %v1590_v60  ;;  %v1645_v55 = vld [vmem:[%s4052_s7 + $0x30] sm:$0xff]  ;;  %v1647_v21 = vld [vmem:[%s4052_s7 + $0x40] sm:$0xff]  ;;  %v1648_v28 = vld [vmem:[%s4052_s7 + $0x48] sm:$0xff] }
 0x341   : > { %v2842_v35 = vpop.eup %2841  ;;  %1762 = vmatpush1.msra.mxu0 %v1627_v41  ;;  %v1587_v37 = vmul.f32 0.5, %v2840_v49  ;;  %v1621_v40 = vadd.f32 0.5, %v1589_v42  ;;  %v1649_v41 = vld [vmem:[%s4052_s7 + $0x50] sm:$0xff]  ;;  %v1650_v49 = vld [vmem:[%s4052_s7 + $0x58] sm:$0xff]  ;;  %v1652_v60 = vld [vmem:[%s4052_s7 + $0x68] sm:$0xff] }
 0x342   : > { %v2844_v4 = vpop.eup %2843  ;;  %1763 = vmatprep.subr.mxu0 %v1626_v53  ;;  %v1586_v39 = vmul.f32 0.5, %v2842_v35  ;;  %v1620_v12 = vadd.f32 0.5, %v1588_v50  ;;  %v1651_v53 = vld [vmem:[%s4052_s7 + $0x60] sm:$0xff]  ;;  %v1653_v35 = vld [vmem:[%s4052_s7 + $0x70] sm:$0xff]  ;;  %v1654_v42 = vld [vmem:[%s4052_s7 + $0x78] sm:$0xff] }
 0x343   : > { %v2846_v43 = vpop.eup %2845  ;;  %1764 = vmatpush1.msra.mxu0 %v1625_v47  ;;  %v1585_v38 = vmul.f32 0.5, %v2844_v4  ;;  %v1619_v15 = vadd.f32 0.5, %v1587_v37 }
 0x344   : > { %v2848_v26 = vpop.eup %2847  ;;  %1765 = vmatprep.subr.mxu0 %v1624_v36  ;;  %v1584_v56 = vmul.f32 0.5, %v2846_v43  ;;  %v1618_v22 = vadd.f32 0.5, %v1586_v39 }
 0x345   : > { %v2850_v44 = vpop.eup %2849  ;;  %1766 = vmatpush1.msra.mxu0 %v1623_v45  ;;  %v1583_v13 = vmul.f32 0.5, %v2848_v26  ;;  %v1617_v19 = vadd.f32 0.5, %v1585_v38 }
 0x346   : > { %v2852_v7 = vpop.eup %2851  ;;  %1767 = vmatprep.subr.mxu0 %v1622_v58  ;;  %v1582_v14 = vmul.f32 0.5, %v2850_v44  ;;  %v1616_v23 = vadd.f32 0.5, %v1584_v56 }
 0x347   : > { %v2854_v52 = vpop.eup %2853  ;;  %1768 = vmatpush1.msra.mxu0 %v1621_v40  ;;  %v1581_v51 = vmul.f32 0.5, %v2852_v7  ;;  %v1615_v27 = vadd.f32 0.5, %v1583_v13 }
 0x348   : > { %v2856_v9 = vpop.eup %2855  ;;  %1769 = vmatprep.subr.mxu0 %v1620_v12  ;;  %v1580_v16 = vmul.f32 0.5, %v2854_v52  ;;  %v1614_v10 = vadd.f32 0.5, %v1582_v14  ;;  %v1744_v52 = vpop.permute.xlu1 %1743 }
 0x349   : > { %v2858_v29 = vpop.eup %2857  ;;  %1770 = vmatpush1.msra.mxu0 %v1619_v15  ;;  %v1579_v20 = vmul.f32 0.5, %v2856_v9  ;;  %v1613_v25 = vadd.f32 0.5, %v1581_v51  ;;  %v1749_v15 = vpop.permute.xlu0 %1748 }
 0x34a   : > { %v2860_v31 = vpop.eup %2859  ;;  %1771 = vmatprep.subr.mxu0 %v1618_v22  ;;  %v1578_v18 = vmul.f32 0.5, %v2858_v29  ;;  %v1612_v11 = vadd.f32 0.5, %v1580_v16 }
 0x34b   : > { %v2862_v17 = vpop.eup %2861  ;;  %1772 = vmatpush1.msra.mxu0 %v1617_v19  ;;  %v1577_v5 = vmul.f32 0.5, %v2860_v31  ;;  %v1611_v54 = vadd.f32 0.5, %v1579_v20 }
 0x34c   : > { %v2864_v32 = vpop.eup %2863  ;;  %1773 = vmatprep.subr.mxu0 %v1616_v23  ;;  %v1576_v24 = vmul.f32 0.5, %v2862_v17  ;;  %v1610_v30 = vadd.f32 0.5, %v1578_v18  ;;  %v1734_v14 = vpop.permute.xlu1 %1733 }
 0x34d   : > { %1774 = vmatpush1.msra.mxu0 %v1615_v27  ;;  %v1575_v0 = vmul.f32 0.5, %v2864_v32  ;;  %v1609_v63 = vadd.f32 0.5, %v1577_v5  ;;  %v1739_v51 = vpop.permute.xlu0 %1738 }
 0x34e   : > { %1775 = vmatprep.subr.mxu0 %v1614_v10  ;;  %v1608_v3 = vadd.f32 0.5, %v1576_v24 }
 0x34f   : > { %1776 = vmatpush1.msra.mxu0 %v1613_v25  ;;  %v1607_v6 = vadd.f32 0.5, %v1575_v0 }
 0x350   : > { %1777 = vmatprep.subr.mxu0 %v1612_v11  ;;  %v1724_v23 = vpop.permute.xlu1 %1723 }
 0x351   : > { %1778 = vmatpush1.msra.mxu0 %v1611_v54  ;;  %v1729_v17 = vpop.permute.xlu0 %1728 }
 0x352   : > { %1779 = vmatprep.subr.mxu0 %v1610_v30 }
 0x353   : > { %1780 = vmatpush1.msra.mxu0 %v1609_v63 }
 0x354   : > { %1781 = vmatprep.subr.mxu0 %v1608_v3  ;;  %v1714_v32 = vpop.permute.xlu1 %1713 }
 0x355   : > { %1782 = vmatpush1.msra.mxu0 %v1607_v6  ;;  %v1719_v18 = vpop.permute.xlu0 %1718 }
 0x356   : > { %1816 = vmatmul.mubr.f32.vlgmr.msra.gmra.mxu0 %v1639_v33 }
 0x357   : > { %1821 = vmatprep.mubr.f32.mxu0 %v3056_v46 }
 0x358   : > { %v1704_v24 = vpop.permute.xlu1 %1703 }
 0x359   : > { %v1709_v54 = vpop.permute.xlu0 %1708 }
 0x35a   : > { %1822 = vmatmul.mubr.f32.gmra.mxu0 %v1640_v34 }
 0x35b   : > { %1827 = vmatprep.mubr.f32.mxu0 %v3056_v46 }
 0x35e   : > { %1828 = vmatmul.mubr.f32.gmra.mxu0 %v1641_v48 }
 0x35f   : > { %1833 = vmatprep.mubr.f32.mxu0 %v3056_v46 }
 0x362   : > { %1834 = vmatmul.mubr.f32.gmra.mxu0 %v1642_v57 }
 0x363   : > { %1839 = vmatprep.mubr.f32.mxu0 %v3056_v46 }
 0x366   : > { %1840 = vmatmul.mubr.f32.gmra.mxu0 %v1643_v2 }
 0x367   : > { %1845 = vmatprep.mubr.f32.mxu0 %v3056_v46 }
 0x36a   : > { %1846 = vmatmul.mubr.f32.gmra.mxu0 %v1644_v8  ;;  %v3857_v8 = vpop.permute.xlu1 %1693 }
 0x36b   : > { %1851 = vmatprep.mubr.f32.mxu0 %v3056_v46 }
 0x36e   : > { %1852 = vmatmul.mubr.f32.gmra.mxu0 %v1645_v55 }
 0x36f   : > { %1857 = vmatprep.mubr.f32.mxu0 %v3056_v46 }
 0x372   : > { %1858 = vmatmul.mubr.f32.gmra.mxu0 %v1646_v61 }
 0x373   : > { %1863 = vmatprep.mubr.f32.mxu0 %v3056_v46 }
 0x376   : > { %1864 = vmatmul.mubr.f32.gmra.mxu0 %v1647_v21 }
 0x377   : > { %1869 = vmatprep.mubr.f32.mxu0 %v3056_v46 }
 0x37a   : > { %1870 = vmatmul.mubr.f32.gmra.mxu0 %v1648_v28 }
 0x37b   : > { %1875 = vmatprep.mubr.f32.mxu0 %v3056_v46 }
 0x37e   : > { %1876 = vmatmul.mubr.f32.gmra.mxu0 %v1649_v41 }
 0x37f   : > { %1881 = vmatprep.mubr.f32.mxu0 %v3056_v46 }
 0x382   : > { %1882 = vmatmul.mubr.f32.gmra.mxu0 %v1650_v49 }
 0x383   : > { %1887 = vmatprep.mubr.f32.mxu0 %v3056_v46 }
 0x386   : > { %1888 = vmatmul.mubr.f32.gmra.mxu0 %v1651_v53  ;;  %v1699_v53 = vpop.permute.xlu0 %1698 }
 0x387   : > { %1893 = vmatprep.mubr.f32.mxu0 %v3056_v46 }
 0x38a   : > { %1894 = vmatmul.mubr.f32.gmra.mxu0 %v1652_v60 }
 0x38b   : > { %1899 = vmatprep.mubr.f32.mxu0 %v3056_v46 }
 0x38e   : > { %1900 = vmatmul.mubr.f32.gmra.mxu0 %v1653_v35 }
 0x38f   : > { %1905 = vmatprep.mubr.f32.mxu0 %v3056_v46 }
 0x392   : > { %1906 = vmatmul.mubr.f32.gmra.mxu0 %v1654_v42 }
 0x393   : > { %2516 = vmatprep.mubr.f32.mxu0 %v3056_v46 }
 0x416   : > { %v3825_v47 = vpop.f32.mrf.mxu0 }
 0x418   : > { %v3827_v4 = vpop.f32.mrf.mxu0 }
 0x41a   : > { %v3829_v36 = vpop.f32.mrf.mxu0 }
 0x41c   : > { %v3831_v50 = vpop.f32.mrf.mxu0 }
 0x41e   : > { %v3833_v43 = vpop.f32.mrf.mxu0 }
 0x420   : > { %v3835_v37 = vpop.f32.mrf.mxu0 }
 0x422   : > { %v3837_v45 = vpop.f32.mrf.mxu0 }
 0x424   : > { %v3839_v26 = vpop.f32.mrf.mxu0 }
 0x426   : > { %v3841_v58 = vpop.f32.mrf.mxu0 }
 0x428   : > { %v3843_v39 = vpop.f32.mrf.mxu0 }
 0x42a   : > { %v3845_v44 = vpop.f32.mrf.mxu0 }
 0x42c   : > { %v3847_v38 = vpop.f32.mrf.mxu0 }
 0x42e   : > { %v3849_v40 = vpop.f32.mrf.mxu0 }
 0x430   : > { %v3851_v7 = vpop.f32.mrf.mxu0 }
 0x432   : > { %v3853_v12 = vpop.f32.mrf.mxu0 }
 0x434   : > { %v3855_v56 = vpop.f32.mrf.mxu0 }
 0x436   : > { %v1865_v13 = vpop.f32.mrf.mxu0 }
 0x438   : > { %v1867_v9 = vpop.f32.mrf.mxu0 }
 0x43a   : > { %v1871_v22 = vpop.f32.mrf.mxu0 }
 0x43c   : > { %v1873_v29 = vpop.f32.mrf.mxu0 }
 0x43e   : > { %v1877_v19 = vpop.f32.mrf.mxu0 }
 0x440   : > { %v1879_v31 = vpop.f32.mrf.mxu0 }
 0x441   : > { %v1880_v42 = vadd.f32 %v1879_v31, %v1724_v23  ;;  %v1862_v31 = vadd.f32 %v3855_v56, %v1709_v54  ;;  %v1850_v56 = vadd.f32 %v3847_v38, %v1699_v53 }
 0x442   : > { %v1883_v16 = vpop.f32.mrf.mxu0 }
 0x443   : > { %v1884_v60 = vadd.f32 %v1883_v16, %v1729_v17  ;;  %v1689_v16 = vpop.permute.xlu0 %1688 }
 0x444   : > { %v1885_v20 = vpop.f32.mrf.mxu0 }
 0x445   : > { %v1886_v28 = vadd.f32 %v1885_v20, %v1729_v17  ;;  %v1934_v20 = vmul.f32 0.5, %v1884_v60  ;;  %v1866_v17 = vadd.f32 %v1865_v13, %v1714_v32 }
 0x446   : > { %v1889_v27 = vpop.f32.mrf.mxu0 }
 0x447   : > { %v1890_v55 = vadd.f32 %v1889_v27, %v1734_v14  ;;  %v1872_v27 = vadd.f32 %v1871_v22, %v1719_v18 }
 0x448   : > { %v1891_v10 = vpop.f32.mrf.mxu0 }
 0x449   : > { %v1892_v48 = vadd.f32 %v1891_v10, %v1734_v14  ;;  %v1878_v10 = vadd.f32 %v1877_v19, %v1724_v23  ;;  %v1684_v14 = vpop.permute.xlu1 %1683  ;;  %v1860_v19 = vadd.f32 %v3853_v12, %v1709_v54  ;;  %v1856_v23 = vadd.f32 %v3851_v7, %v1704_v24  ;;  %v1679_v12 = vpop.permute.xlu0 %1678 }
 0x44a   : > { %v1895_v5 = vpop.f32.mrf.mxu0  ;;  %v1848_v7 = vadd.f32 %v3845_v44, %v1699_v53  ;;  %v1832_v44 = vadd.f32 %v3835_v37, %v1684_v14  ;;  %v1830_v53 = vadd.f32 %v3833_v43, %v1684_v14 }
 0x44b   : > { %v1896_v33 = vadd.f32 %v1895_v5, %v1739_v51  ;;  %v1936_v5 = vmul.f32 0.5, %v1890_v55  ;;  %v1838_v55 = vadd.f32 %v3839_v26, %v1689_v16 }
 0x44c   : > { %v1897_v25 = vpop.f32.mrf.mxu0  ;;  %v1916_v14 = vmul.f32 0.5, %v1830_v53 }
 0x44d   : > { %v1898_v11 = vadd.f32 %v1897_v25, %v1739_v51  ;;  %v1938_v35 = vmul.f32 0.5, %v1896_v33  ;;  %v1874_v25 = vadd.f32 %v1873_v29, %v1719_v18  ;;  %v1930_v29 = vmul.f32 0.5, %v1872_v27  ;;  %v1674_v18 = vpop.permute.xlu1 %1673 }
 0x44e   : > { %v1901_v0 = vpop.f32.mrf.mxu0  ;;  %v3864_v13 = vadd.f32 %v3825_v47, %v1674_v18  ;;  %v3868_v54 = vadd.f32 %v3827_v4, %v1674_v18  ;;  %v1926_v33 = vmul.f32 0.5, %v1860_v19  ;;  %v1844_v47 = vadd.f32 %v3843_v39, %v3857_v8 }
 0x44f   : > { %v1902_v30 = vadd.f32 %v1901_v0, %v1744_v52  ;;  %v1939_v3 = vmul.f32 0.5, %v1898_v11  ;;  %v1935_v11 = vmul.f32 0.5, %v1886_v28  ;;  %v1868_v0 = vadd.f32 %v1867_v9, %v1714_v32 }
 0x450   : > { %v1903_v63 = vpop.f32.mrf.mxu0  ;;  %v1854_v9 = vadd.f32 %v3849_v40, %v1704_v24  ;;  %v1927_v32 = vmul.f32 0.5, %v1862_v31  ;;  %v1824_v40 = vadd.f32 %v3829_v36, %v1679_v12  ;;  %v1925_v24 = vmul.f32 0.5, %v1856_v23 }
 0x451   : > { %v1904_v6 = vadd.f32 %v1903_v63, %v1744_v52  ;;  %v1940_v61 = vmul.f32 0.5, %v1902_v30  ;;  %2865 = vtanh.f32 %v1939_v3  ;;  %v1937_v52 = vmul.f32 0.5, %v1892_v48 }
 0x452   : > { %v1907_v34 = vpop.f32.mrf.mxu0  ;;  %v1932_v30 = vmul.f32 0.5, %v1878_v10  ;;  %v1931_v63 = vmul.f32 0.5, %v1874_v25  ;;  %v1929_v22 = vmul.f32 0.5, %v1868_v0  ;;  %v1928_v3 = vmul.f32 0.5, %v1866_v17 }
 0x453   : > { %v1941_v57 = vmul.f32 0.5, %v1904_v6  ;;  %v1908_v2 = vadd.f32 %v1907_v34, %v1749_v15  ;;  %v1826_v48 = vadd.f32 %v3831_v50, %v1679_v12  ;;  %v1924_v4 = vmul.f32 0.5, %v1854_v9 }
 0x454   : > { %v1909_v21 = vpop.f32.mrf.mxu0  ;;  %v1836_v39 = vadd.f32 %v3837_v45, %v1689_v16  ;;  %v1921_v50 = vmul.f32 0.5, %v1844_v47  ;;  %v1914_v19 = vmul.f32 0.5, %v1824_v40  ;;  %v1913_v18 = vmul.f32 0.5, %v3868_v54 }
 0x455   : > { %v1942_v41 = vmul.f32 0.5, %v1908_v2  ;;  %v1910_v49 = vadd.f32 %v1909_v21, %v1749_v15  ;;  %2867 = vtanh.f32 %v1941_v57  ;;  %v1933_v15 = vmul.f32 0.5, %v1880_v42 }
 0x456   : > { %v1842_v57 = vadd.f32 %v3841_v58, %v3857_v8  ;;  %v1922_v21 = vmul.f32 0.5, %v1848_v7  ;;  %v1915_v17 = vmul.f32 0.5, %v1826_v48 }
 0x457   : > { %2869 = vtanh.f32 %v1942_v41  ;;  %v1943_v51 = vmul.f32 0.5, %v1910_v49 }
 0x458   : > { %2871 = vtanh.f32 %v1940_v61  ;;  %v1923_v61 = vmul.f32 0.5, %v1850_v56  ;;  %v1920_v60 = vmul.f32 0.5, %v1842_v57 }
 0x459   : > { %2873 = vtanh.f32 %v1943_v51  ;;  %v1918_v51 = vmul.f32 0.5, %v1836_v39 }
 0x45a   : > { %2875 = vtanh.f32 %v1938_v35  ;;  %v1919_v35 = vmul.f32 0.5, %v1838_v55 }
 0x45b   : > { %2877 = vtanh.f32 %v1937_v52 }
 0x45c   : > { %2879 = vtanh.f32 %v1936_v5 }
 0x45d   : > { %2881 = vtanh.f32 %v1935_v11  ;;  %v1917_v11 = vmul.f32 0.5, %v1832_v44 }
 0x45e   : > { %2883 = vtanh.f32 %v1934_v20  ;;  %v2866_v6 = vpop.eup %2865 }
 0x45f   : > { %2885 = vtanh.f32 %v1933_v15  ;;  %v2003_v52 = vmul.f32 0.5, %v2866_v6 }
 0x460   : > { %2887 = vtanh.f32 %v1932_v30 }
 0x461   : > { %2889 = vtanh.f32 %v1931_v63  ;;  %v2035_v30 = vadd.f32 0.5, %v2003_v52 }
 0x462   : > { %2891 = vtanh.f32 %v1930_v29  ;;  %v2868_v34 = vpop.eup %2867 }
 0x463   : > { %2893 = vtanh.f32 %v1929_v22  ;;  %v2005_v58 = vmul.f32 0.5, %v2868_v34 }
 0x464   : > { %v2870_v38 = vpop.eup %2869  ;;  %2895 = vtanh.f32 %v1928_v3 }
 0x465   : > { %v2872_v2 = vpop.eup %2871  ;;  %2897 = vtanh.f32 %v1927_v32  ;;  %v2006_v28 = vmul.f32 0.5, %v2870_v38  ;;  %v2037_v27 = vadd.f32 0.5, %v2005_v58  ;;  %v1912_v32 = vmul.f32 0.5, %v3864_v13 }
 0x466   : > { %v2874_v36 = vpop.eup %2873  ;;  %2899 = vtanh.f32 %v1926_v33  ;;  %v2004_v37 = vmul.f32 0.5, %v2872_v2 }
 0x467   : > { %v2876_v41 = vpop.eup %2875  ;;  %2901 = vtanh.f32 %v1925_v24  ;;  %v2007_v49 = vmul.f32 0.5, %v2874_v36  ;;  %v2038_v5 = vadd.f32 0.5, %v2006_v28 }
 0x468   : > { %v2878_v8 = vpop.eup %2877  ;;  %2903 = vtanh.f32 %v1924_v4  ;;  %v2002_v10 = vmul.f32 0.5, %v2876_v41  ;;  %v2036_v15 = vadd.f32 0.5, %v2004_v37 }
 0x469   : > { %v2880_v26 = vpop.eup %2879  ;;  %2905 = vtanh.f32 %v1923_v61  ;;  %v2039_v42 = vadd.f32 0.5, %v2007_v49  ;;  %v2001_v20 = vmul.f32 0.5, %v2878_v8 }
 0x46a   : > { %v2882_v45 = vpop.eup %2881  ;;  %2907 = vtanh.f32 %v1922_v21  ;;  %v2000_v0 = vmul.f32 0.5, %v2880_v26  ;;  %v2034_v23 = vadd.f32 0.5, %v2002_v10 }
 0x46b   : > { %v2884_v25 = vpop.eup %2883  ;;  %2909 = vtanh.f32 %v1921_v50  ;;  %2152 = vmatprep.subr.mxu1 %v2039_v42  ;;  %v1999_v31 = vmul.f32 0.5, %v2882_v45  ;;  %v2033_v9 = vadd.f32 0.5, %v2001_v20 }
 0x46c   : > { %v2886_v43 = vpop.eup %2885  ;;  %2911 = vtanh.f32 %v1920_v60  ;;  %2153 = vmatpush1.msra.mxu1 %v2038_v5  ;;  %v1998_v29 = vmul.f32 0.5, %v2884_v25  ;;  %v2032_v12 = vadd.f32 0.5, %v2000_v0 }
 0x46d   : > { %v2888_v16 = vpop.eup %2887  ;;  %2913 = vtanh.f32 %v1919_v35  ;;  %2154 = vmatprep.subr.mxu1 %v2037_v27  ;;  %v1997_v3 = vmul.f32 0.5, %v2886_v43  ;;  %v2031_v33 = vadd.f32 0.5, %v1999_v31 }
 0x46e   : > { %v2890_v63 = vpop.eup %2889  ;;  %2915 = vtanh.f32 %v1918_v51  ;;  %2155 = vmatpush1.msra.mxu1 %v2036_v15  ;;  %v1996_v6 = vmul.f32 0.5, %v2888_v16  ;;  %v2030_v54 = vadd.f32 0.5, %v1998_v29 }
 0x46f   : > { %v2892_v22 = vpop.eup %2891  ;;  %2917 = vtanh.f32 %v1917_v11  ;;  %2156 = vmatprep.subr.mxu1 %v2035_v30  ;;  %v1995_v34 = vmul.f32 0.5, %v2890_v63  ;;  %v2029_v38 = vadd.f32 0.5, %v1997_v3 }
 0x470   : > { %v2894_v56 = vpop.eup %2893  ;;  %2919 = vtanh.f32 %v1916_v14  ;;  %2157 = vmatpush1.msra.mxu1 %v2034_v23  ;;  %v1994_v47 = vmul.f32 0.5, %v2892_v22  ;;  %v2028_v4 = vadd.f32 0.5, %v1996_v6 }
 0x471   : > { %v2896_v7 = vpop.eup %2895  ;;  %2921 = vtanh.f32 %v1915_v17  ;;  %2158 = vmatprep.subr.mxu1 %v2033_v9  ;;  %v1993_v48 = vmul.f32 0.5, %v2894_v56  ;;  %v2027_v44 = vadd.f32 0.5, %v1995_v34  ;;  %v2041_v34 = vld [vmem:[%s4054_s9 + $0x8] sm:$0xff] }
 0x472   : > { %v2898_v40 = vpop.eup %2897  ;;  %2923 = vtanh.f32 %v1914_v19  ;;  %2159 = vmatpush1.msra.mxu1 %v2032_v12  ;;  %v1992_v57 = vmul.f32 0.5, %v2896_v7  ;;  %v2026_v39 = vadd.f32 0.5, %v1994_v47  ;;  %v2043_v47 = vld [vmem:[%s4054_s9 + $0x18] sm:$0xff] }
 0x473   : > { %v2900_v24 = vpop.eup %2899  ;;  %2925 = vtanh.f32 %v1913_v18  ;;  %2160 = vmatprep.subr.mxu1 %v2031_v33  ;;  %v1991_v55 = vmul.f32 0.5, %v2898_v40  ;;  %v2025_v28 = vadd.f32 0.5, %v1993_v48  ;;  %v2040_v33 = vld [vmem:[%s4054_s9] sm:$0xff]  ;;  %v2042_v40 = vld [vmem:[%s4054_s9 + $0x10] sm:$0xff]  ;;  %v2047_v48 = vld [vmem:[%s4054_s9 + $0x38] sm:$0xff] }
 0x474   : > { %v2902_v13 = vpop.eup %2901  ;;  %2927 = vtanh.f32 %v1912_v32  ;;  %2161 = vmatpush1.msra.mxu1 %v2030_v54  ;;  %v1990_v36 = vmul.f32 0.5, %v2900_v24  ;;  %v2024_v58 = vadd.f32 0.5, %v1992_v57  ;;  %v2044_v54 = vld [vmem:[%s4054_s9 + $0x20] sm:$0xff]  ;;  %v2045_v24 = vld [vmem:[%s4054_s9 + $0x28] sm:$0xff] }
 0x475   : > { %v2904_v2 = vpop.eup %2903  ;;  %2162 = vmatprep.subr.mxu1 %v2029_v38  ;;  %v1989_v41 = vmul.f32 0.5, %v2902_v13  ;;  %v2023_v53 = vadd.f32 0.5, %v1991_v55  ;;  %v2046_v38 = vld [vmem:[%s4054_s9 + $0x30] sm:$0xff]  ;;  %v2048_v13 = vld [vmem:[%s4054_s9 + $0x40] sm:$0xff]  ;;  %v2049_v57 = vld [vmem:[%s4054_s9 + $0x48] sm:$0xff] }
 0x476   : > { %v2906_v61 = vpop.eup %2905  ;;  %2163 = vmatpush1.msra.mxu1 %v2028_v4  ;;  %v1988_v49 = vmul.f32 0.5, %v2904_v2  ;;  %v2022_v35 = vadd.f32 0.5, %v1990_v36  ;;  %v2050_v4 = vld [vmem:[%s4054_s9 + $0x50] sm:$0xff]  ;;  %v2051_v2 = vld [vmem:[%s4054_s9 + $0x58] sm:$0xff]  ;;  %v2053_v55 = vld [vmem:[%s4054_s9 + $0x68] sm:$0xff] }
 0x477   : > { %v2908_v21 = vpop.eup %2907  ;;  %2164 = vmatprep.subr.mxu1 %v2027_v44  ;;  %v1987_v60 = vmul.f32 0.5, %v2906_v61  ;;  %v2021_v52 = vadd.f32 0.5, %v1989_v41  ;;  %v2052_v44 = vld [vmem:[%s4054_s9 + $0x60] sm:$0xff]  ;;  %v2054_v61 = vld [vmem:[%s4054_s9 + $0x70] sm:$0xff]  ;;  %v2055_v36 = vld [vmem:[%s4054_s9 + $0x78] sm:$0xff] }
 0x478   : > { %v2910_v50 = vpop.eup %2909  ;;  %2165 = vmatpush1.msra.mxu1 %v2026_v39  ;;  %v1986_v26 = vmul.f32 0.5, %v2908_v21  ;;  %v2020_v5 = vadd.f32 0.5, %v1988_v49 }
 0x479   : > { %v2912_v8 = vpop.eup %2911  ;;  %2166 = vmatprep.subr.mxu1 %v2025_v28  ;;  %v1985_v45 = vmul.f32 0.5, %v2910_v50  ;;  %v2019_v11 = vadd.f32 0.5, %v1987_v60 }
 0x47a   : > { %v2914_v37 = vpop.eup %2913  ;;  %2167 = vmatpush1.msra.mxu1 %v2024_v58  ;;  %v1984_v10 = vmul.f32 0.5, %v2912_v8  ;;  %v2018_v14 = vadd.f32 0.5, %v1986_v26 }
 0x47b   : > { %v2916_v42 = vpop.eup %2915  ;;  %2168 = vmatprep.subr.mxu1 %v2023_v53  ;;  %v1983_v27 = vmul.f32 0.5, %v2914_v37  ;;  %v2017_v15 = vadd.f32 0.5, %v1985_v45  ;;  %v2145_v45 = vpop.permute.xlu1 %2144 }
 0x47c   : > { %v2918_v51 = vpop.eup %2917  ;;  %2169 = vmatpush1.msra.mxu1 %v2022_v35  ;;  %v1982_v43 = vmul.f32 0.5, %v2916_v42  ;;  %v2016_v31 = vadd.f32 0.5, %v1984_v10  ;;  %v2150_v10 = vpop.permute.xlu0 %2149 }
 0x47d   : > { %v2920_v25 = vpop.eup %2919  ;;  %2170 = vmatprep.subr.mxu1 %v2021_v52  ;;  %v1981_v16 = vmul.f32 0.5, %v2918_v51  ;;  %v2015_v19 = vadd.f32 0.5, %v1983_v27 }
 0x47e   : > { %v2922_v20 = vpop.eup %2921  ;;  %2171 = vmatpush1.msra.mxu1 %v2020_v5  ;;  %v1980_v30 = vmul.f32 0.5, %v2920_v25  ;;  %v2014_v22 = vadd.f32 0.5, %v1982_v43 }
 0x47f   : > { %v2924_v0 = vpop.eup %2923  ;;  %2172 = vmatprep.subr.mxu1 %v2019_v11  ;;  %v1979_v29 = vmul.f32 0.5, %v2922_v20  ;;  %v2013_v18 = vadd.f32 0.5, %v1981_v16  ;;  %v2135_v11 = vpop.permute.xlu1 %2134 }
 0x480   : > { %v2926_v17 = vpop.eup %2925  ;;  %2173 = vmatpush1.msra.mxu1 %v2018_v14  ;;  %v1978_v23 = vmul.f32 0.5, %v2924_v0  ;;  %v2012_v56 = vadd.f32 0.5, %v1980_v30  ;;  %v2140_v20 = vpop.permute.xlu0 %2139 }
 0x481   : > { %v2928_v63 = vpop.eup %2927  ;;  %2174 = vmatprep.subr.mxu1 %v2017_v15  ;;  %v1977_v9 = vmul.f32 0.5, %v2926_v17  ;;  %v2011_v32 = vadd.f32 0.5, %v1979_v29 }
 0x482   : > { %2175 = vmatpush1.msra.mxu1 %v2016_v31  ;;  %v1976_v3 = vmul.f32 0.5, %v2928_v63  ;;  %v2010_v6 = vadd.f32 0.5, %v1978_v23 }
 0x483   : > { %2176 = vmatprep.subr.mxu1 %v2015_v19  ;;  %v2009_v12 = vadd.f32 0.5, %v1977_v9  ;;  %v2125_v0 = vpop.permute.xlu1 %2124 }
 0x484   : > { %2177 = vmatpush1.msra.mxu1 %v2014_v22  ;;  %v2008_v7 = vadd.f32 0.5, %v1976_v3  ;;  %v2130_v16 = vpop.permute.xlu0 %2129 }
 0x485   : > { %2178 = vmatprep.subr.mxu1 %v2013_v18 }
 0x486   : > { %2179 = vmatpush1.msra.mxu1 %v2012_v56 }
 0x487   : > { %2180 = vmatprep.subr.mxu1 %v2011_v32  ;;  %v2115_v31 = vpop.permute.xlu1 %2114 }
 0x488   : > { %2181 = vmatpush1.msra.mxu1 %v2010_v6  ;;  %v2120_v19 = vpop.permute.xlu0 %2119 }
 0x489   : > { %2182 = vmatprep.subr.mxu1 %v2009_v12 }
 0x48a   : > { %2183 = vmatpush1.msra.mxu1 %v2008_v7 }
 0x48b   : > { %2217 = vmatmul.mubr.f32.vlgmr.msra.gmra.mxu1 %v2040_v33  ;;  %v2105_v18 = vpop.permute.xlu1 %2104 }
 0x48c   : > { %2222 = vmatprep.mubr.f32.mxu1 %v3056_v46  ;;  %v2110_v3 = vpop.permute.xlu0 %2109 }
 0x48f   : > { %2223 = vmatmul.mubr.f32.gmra.mxu1 %v2041_v34 }
 0x490   : > { %2228 = vmatprep.mubr.f32.mxu1 %v3056_v46 }
 0x493   : > { %2229 = vmatmul.mubr.f32.gmra.mxu1 %v2042_v40 }
 0x494   : > { %2234 = vmatprep.mubr.f32.mxu1 %v3056_v46 }
 0x497   : > { %2235 = vmatmul.mubr.f32.gmra.mxu1 %v2043_v47 }
 0x498   : > { %2240 = vmatprep.mubr.f32.mxu1 %v3056_v46 }
 0x49b   : > { %2241 = vmatmul.mubr.f32.gmra.mxu1 %v2044_v54  ;;  %v3978_v54 = vpop.permute.xlu1 %2094 }
 0x49c   : > { %2246 = vmatprep.mubr.f32.mxu1 %v3056_v46 }
 0x49f   : > { %2247 = vmatmul.mubr.f32.gmra.mxu1 %v2045_v24 }
 0x4a0   : > { %2252 = vmatprep.mubr.f32.mxu1 %v3056_v46 }
 0x4a3   : > { %2253 = vmatmul.mubr.f32.gmra.mxu1 %v2046_v38 }
 0x4a4   : > { %2258 = vmatprep.mubr.f32.mxu1 %v3056_v46 }
 0x4a7   : > { %2259 = vmatmul.mubr.f32.gmra.mxu1 %v2047_v48 }
 0x4a8   : > { %2264 = vmatprep.mubr.f32.mxu1 %v3056_v46 }
 0x4ab   : > { %2265 = vmatmul.mubr.f32.gmra.mxu1 %v2048_v13 }
 0x4ac   : > { %2270 = vmatprep.mubr.f32.mxu1 %v3056_v46 }
 0x4af   : > { %2271 = vmatmul.mubr.f32.gmra.mxu1 %v2049_v57 }
 0x4b0   : > { %2276 = vmatprep.mubr.f32.mxu1 %v3056_v46 }
 0x4b3   : > { %2277 = vmatmul.mubr.f32.gmra.mxu1 %v2050_v4 }
 0x4b4   : > { %2282 = vmatprep.mubr.f32.mxu1 %v3056_v46 }
 0x4b7   : > { %2283 = vmatmul.mubr.f32.gmra.mxu1 %v2051_v2  ;;  %v2100_v2 = vpop.permute.xlu0 %2099 }
 0x4b8   : > { %2288 = vmatprep.mubr.f32.mxu1 %v3056_v46 }
 0x4bb   : > { %2289 = vmatmul.mubr.f32.gmra.mxu1 %v2052_v44 }
 0x4bc   : > { %2294 = vmatprep.mubr.f32.mxu1 %v3056_v46 }
 0x4bf   : > { %2295 = vmatmul.mubr.f32.gmra.mxu1 %v2053_v55 }
 0x4c0   : > { %2300 = vmatprep.mubr.f32.mxu1 %v3056_v46 }
 0x4c3   : > { %2301 = vmatmul.mubr.f32.gmra.mxu1 %v2054_v61 }
 0x4c4   : > { %2306 = vmatprep.mubr.f32.mxu1 %v3056_v46 }
 0x4c7   : > { %2307 = vmatmul.mubr.f32.gmra.mxu1 %v2055_v36 }
 0x54b   : > { %v3946_v39 = vpop.f32.mrf.mxu1 }
 0x54d   : > { %v3948_v21 = vpop.f32.mrf.mxu1 }
 0x54f   : > { %v3950_v28 = vpop.f32.mrf.mxu1 }
 0x551   : > { %v3952_v41 = vpop.f32.mrf.mxu1 }
 0x553   : > { %v3954_v50 = vpop.f32.mrf.mxu1 }
 0x555   : > { %v3956_v49 = vpop.f32.mrf.mxu1 }
 0x557   : > { %v3958_v58 = vpop.f32.mrf.mxu1 }
 0x559   : > { %v3960_v46 = vpop.f32.mrf.mxu1 }
 0x55b   : > { %v3962_v8 = vpop.f32.mrf.mxu1 }
 0x55d   : > { %v3964_v53 = vpop.f32.mrf.mxu1 }
 0x55f   : > { %v3966_v60 = vpop.f32.mrf.mxu1 }
 0x561   : > { %v3968_v37 = vpop.f32.mrf.mxu1 }
 0x563   : > { %v3970_v26 = vpop.f32.mrf.mxu1 }
 0x565   : > { %v3972_v35 = vpop.f32.mrf.mxu1 }
 0x567   : > { %v3974_v42 = vpop.f32.mrf.mxu1 }
 0x569   : > { %v3976_v52 = vpop.f32.mrf.mxu1 }
 0x56b   : > { %v2266_v51 = vpop.f32.mrf.mxu1 }
 0x56d   : > { %v2268_v5 = vpop.f32.mrf.mxu1 }
 0x56f   : > { %v2272_v25 = vpop.f32.mrf.mxu1 }
 0x571   : > { %v2274_v27 = vpop.f32.mrf.mxu1 }
 0x573   : > { %v2278_v43 = vpop.f32.mrf.mxu1 }
 0x575   : > { %v2280_v14 = vpop.f32.mrf.mxu1 }
 0x576   : > { %v2281_v61 = vadd.f32 %v2280_v14, %v2125_v0  ;;  %v2263_v14 = vadd.f32 %v3976_v52, %v2110_v3  ;;  %v2251_v52 = vadd.f32 %v3968_v37, %v2100_v2 }
 0x577   : > { %v2284_v15 = vpop.f32.mrf.mxu1 }
 0x578   : > { %v2285_v44 = vadd.f32 %v2284_v15, %v2130_v16  ;;  %v2090_v15 = vpop.permute.xlu0 %2089 }
 0x579   : > { %v2286_v17 = vpop.f32.mrf.mxu1 }
 0x57a   : > { %v2287_v13 = vadd.f32 %v2286_v17, %v2130_v16  ;;  %v2335_v17 = vmul.f32 0.5, %v2285_v44  ;;  %v2267_v16 = vadd.f32 %v2266_v51, %v2115_v31 }
 0x57b   : > { %v2290_v30 = vpop.f32.mrf.mxu1 }
 0x57c   : > { %v2291_v24 = vadd.f32 %v2290_v30, %v2135_v11  ;;  %v2273_v30 = vadd.f32 %v2272_v25, %v2120_v19 }
 0x57d   : > { %v2292_v63 = vpop.f32.mrf.mxu1 }
 0x57e   : > { %v2293_v34 = vadd.f32 %v2292_v63, %v2135_v11  ;;  %v2337_v63 = vmul.f32 0.5, %v2291_v24  ;;  %v2085_v11 = vpop.permute.xlu1 %2084  ;;  %v2324_v24 = vmul.f32 0.5, %v2251_v52 }
 0x57f   : > { %v2296_v29 = vpop.f32.mrf.mxu1 }
 0x580   : > { %v2297_v7 = vadd.f32 %v2296_v29, %v2140_v20  ;;  %v2338_v36 = vmul.f32 0.5, %v2293_v34  ;;  %v2275_v29 = vadd.f32 %v2274_v27, %v2120_v19  ;;  %v2331_v27 = vmul.f32 0.5, %v2273_v30 }
 0x581   : > { %v2298_v23 = vpop.f32.mrf.mxu1  ;;  %v2243_v34 = vadd.f32 %v3962_v8, %v3978_v54 }
 0x582   : > { %v2299_v22 = vadd.f32 %v2298_v23, %v2140_v20  ;;  %v2339_v55 = vmul.f32 0.5, %v2297_v7  ;;  %v2279_v20 = vadd.f32 %v2278_v43, %v2125_v0  ;;  %v2336_v23 = vmul.f32 0.5, %v2287_v13  ;;  %v2075_v19 = vpop.permute.xlu1 %2074 }
 0x583   : > { %v2302_v9 = vpop.f32.mrf.mxu1  ;;  %v2261_v43 = vadd.f32 %v3974_v42, %v2110_v3  ;;  %v2257_v0 = vadd.f32 %v3972_v35, %v2105_v18  ;;  %v3985_v51 = vadd.f32 %v3946_v39, %v2075_v19  ;;  %v2080_v42 = vpop.permute.xlu0 %2079  ;;  %v3989_v3 = vadd.f32 %v3948_v21, %v2075_v19 }
 0x584   : > { %v2303_v56 = vadd.f32 %v2302_v9, %v2145_v45  ;;  %v2340_v6 = vmul.f32 0.5, %v2299_v22  ;;  %v2269_v22 = vadd.f32 %v2268_v5, %v2115_v31  ;;  %v2333_v9 = vmul.f32 0.5, %v2279_v20 }
 0x585   : > { %v2304_v32 = vpop.f32.mrf.mxu1  ;;  %v2255_v5 = vadd.f32 %v3970_v26, %v2105_v18  ;;  %v2328_v31 = vmul.f32 0.5, %v2263_v14  ;;  %v2249_v35 = vadd.f32 %v3966_v60, %v2100_v2  ;;  %v2225_v26 = vadd.f32 %v3950_v28, %v2080_v42 }
 0x586   : > { %v2305_v12 = vadd.f32 %v2304_v32, %v2145_v45  ;;  %v2341_v38 = vmul.f32 0.5, %v2303_v56  ;;  %2929 = vtanh.f32 %v2340_v6  ;;  %v2332_v56 = vmul.f32 0.5, %v2275_v29 }
 0x587   : > { %v2308_v33 = vpop.f32.mrf.mxu1  ;;  %v2330_v25 = vmul.f32 0.5, %v2269_v22  ;;  %v2329_v32 = vmul.f32 0.5, %v2267_v16  ;;  %v2245_v39 = vadd.f32 %v3964_v53, %v3978_v54  ;;  %v2326_v18 = vmul.f32 0.5, %v2257_v0 }
 0x588   : > { %v2342_v40 = vmul.f32 0.5, %v2305_v12  ;;  %v2309_v47 = vadd.f32 %v2308_v33, %v2150_v10  ;;  %v2327_v12 = vmul.f32 0.5, %v2261_v43  ;;  %v2227_v33 = vadd.f32 %v3952_v41, %v2080_v42 }
 0x589   : > { %v2310_v48 = vpop.f32.mrf.mxu1  ;;  %v2325_v21 = vmul.f32 0.5, %v2255_v5  ;;  %v2233_v60 = vadd.f32 %v3956_v49, %v2085_v11  ;;  %v2237_v53 = vadd.f32 %v3958_v58, %v2090_v15  ;;  %v2322_v41 = vmul.f32 0.5, %v2245_v39 }
 0x58a   : > { %v2343_v57 = vmul.f32 0.5, %v2309_v47  ;;  %v2311_v4 = vadd.f32 %v2310_v48, %v2150_v10  ;;  %2931 = vtanh.f32 %v2342_v40  ;;  %v2334_v10 = vmul.f32 0.5, %v2281_v61 }
 0x58b   : > { %v2239_v47 = vadd.f32 %v3960_v46, %v2090_v15  ;;  %v2321_v2 = vmul.f32 0.5, %v2243_v34  ;;  %v2318_v29 = vmul.f32 0.5, %v2233_v60  ;;  %v2316_v15 = vmul.f32 0.5, %v2227_v33 }
 0x58c   : > { %2933 = vtanh.f32 %v2343_v57  ;;  %v2344_v45 = vmul.f32 0.5, %v2311_v4  ;;  %v2231_v4 = vadd.f32 %v3954_v50, %v2085_v11  ;;  %v2313_v52 = vmul.f32 0.5, %v3985_v51 }
 0x58d   : > { %2935 = vtanh.f32 %v2341_v38  ;;  %v2323_v38 = vmul.f32 0.5, %v2249_v35  ;;  %v2320_v44 = vmul.f32 0.5, %v2239_v47 }
 0x58e   : > { %2937 = vtanh.f32 %v2344_v45  ;;  %v2317_v11 = vmul.f32 0.5, %v2231_v4 }
 0x58f   : > { %2939 = vtanh.f32 %v2339_v55 }
 0x590   : > { %2941 = vtanh.f32 %v2338_v36  ;;  %v2319_v36 = vmul.f32 0.5, %v2237_v53 }
 0x591   : > { %2943 = vtanh.f32 %v2337_v63 }
 0x592   : > { %2945 = vtanh.f32 %v2336_v23 }
 0x593   : > { %2947 = vtanh.f32 %v2335_v17  ;;  %v2930_v6 = vpop.eup %2929 }
 0x594   : > { %2949 = vtanh.f32 %v2334_v10  ;;  %v2404_v61 = vmul.f32 0.5, %v2930_v6 }
 0x595   : > { %2951 = vtanh.f32 %v2333_v9 }
 0x596   : > { %2953 = vtanh.f32 %v2332_v56  ;;  %v2436_v16 = vadd.f32 0.5, %v2404_v61  ;;  %v2315_v56 = vmul.f32 0.5, %v2225_v26 }
 0x597   : > { %2955 = vtanh.f32 %v2331_v27  ;;  %v2932_v7 = vpop.eup %2931 }
 0x598   : > { %2957 = vtanh.f32 %v2330_v25  ;;  %v2406_v8 = vmul.f32 0.5, %v2932_v7  ;;  %v2314_v25 = vmul.f32 0.5, %v3989_v3 }
 0x599   : > { %v2934_v37 = vpop.eup %2933  ;;  %2959 = vtanh.f32 %v2329_v32 }
 0x59a   : > { %v2936_v40 = vpop.eup %2935  ;;  %2961 = vtanh.f32 %v2328_v31  ;;  %v2407_v48 = vmul.f32 0.5, %v2934_v37  ;;  %v2438_v23 = vadd.f32 0.5, %v2406_v8 }
 0x59b   : > { %v2938_v28 = vpop.eup %2937  ;;  %2963 = vtanh.f32 %v2327_v12  ;;  %v2405_v49 = vmul.f32 0.5, %v2936_v40 }
 0x59c   : > { %v2940_v13 = vpop.eup %2939  ;;  %2965 = vtanh.f32 %v2326_v18  ;;  %v2408_v57 = vmul.f32 0.5, %v2938_v28  ;;  %v2439_v20 = vadd.f32 0.5, %v2407_v48 }
 0x59d   : > { %v2942_v54 = vpop.eup %2941  ;;  %2967 = vtanh.f32 %v2325_v21  ;;  %v2403_v45 = vmul.f32 0.5, %v2940_v13  ;;  %v2437_v22 = vadd.f32 0.5, %v2405_v49 }
 0x59e   : > { %v2944_v46 = vpop.eup %2943  ;;  %2969 = vtanh.f32 %v2324_v24  ;;  %v2440_v55 = vadd.f32 0.5, %v2408_v57  ;;  %v2402_v30 = vmul.f32 0.5, %v2942_v54 }
 0x59f   : > { %v2946_v58 = vpop.eup %2945  ;;  %2971 = vtanh.f32 %v2323_v38  ;;  %v2401_v17 = vmul.f32 0.5, %v2944_v46  ;;  %v2435_v27 = vadd.f32 0.5, %v2403_v45 }
 0x5a0   : > { %v2948_v63 = vpop.eup %2947  ;;  %2973 = vtanh.f32 %v2322_v41  ;;  %2452 = vmatprep.subr.mxu0 %v2440_v55  ;;  %v2400_v9 = vmul.f32 0.5, %v2946_v58  ;;  %v2434_v19 = vadd.f32 0.5, %v2402_v30 }
 0x5a1   : > { %v2950_v50 = vpop.eup %2949  ;;  %2975 = vtanh.f32 %v2321_v2  ;;  %2453 = vmatpush1.msra.mxu0 %v2439_v20  ;;  %v2399_v43 = vmul.f32 0.5, %v2948_v63  ;;  %v2433_v6 = vadd.f32 0.5, %v2401_v17 }
 0x5a2   : > { %v2952_v10 = vpop.eup %2951  ;;  %2977 = vtanh.f32 %v2320_v44  ;;  %2454 = vmatprep.subr.mxu0 %v2438_v23  ;;  %v2398_v5 = vmul.f32 0.5, %v2950_v50  ;;  %v2432_v35 = vadd.f32 0.5, %v2400_v9 }
 0x5a3   : > { %v2954_v14 = vpop.eup %2953  ;;  %2979 = vtanh.f32 %v2319_v36  ;;  %2455 = vmatpush1.msra.mxu0 %v2437_v22  ;;  %v2397_v31 = vmul.f32 0.5, %v2952_v10  ;;  %v2431_v3 = vadd.f32 0.5, %v2399_v43 }
 0x5a4   : > { %v2956_v0 = vpop.eup %2955  ;;  %2981 = vtanh.f32 %v2318_v29  ;;  %2456 = vmatprep.subr.mxu0 %v2436_v16  ;;  %v2396_v12 = vmul.f32 0.5, %v2954_v14  ;;  %v2430_v18 = vadd.f32 0.5, %v2398_v5 }
 0x5a5   : > { %v2958_v32 = vpop.eup %2957  ;;  %2983 = vtanh.f32 %v2317_v11  ;;  %2457 = vmatpush1.msra.mxu0 %v2435_v27  ;;  %v2395_v26 = vmul.f32 0.5, %v2956_v0  ;;  %v2429_v34 = vadd.f32 0.5, %v2397_v31 }
 0x5a6   : > { %v2960_v42 = vpop.eup %2959  ;;  %2985 = vtanh.f32 %v2316_v15  ;;  %2458 = vmatprep.subr.mxu0 %v2434_v19  ;;  %v2394_v37 = vmul.f32 0.5, %v2958_v32  ;;  %v2428_v40 = vadd.f32 0.5, %v2396_v12 }
 0x5a7   : > { %v2962_v7 = vpop.eup %2961  ;;  %2987 = vtanh.f32 %v2315_v56  ;;  %2459 = vmatpush1.msra.mxu0 %v2433_v6  ;;  %v2393_v33 = vmul.f32 0.5, %v2960_v42  ;;  %v2427_v28 = vadd.f32 0.5, %v2395_v26  ;;  %v2441_v42 = vld [vmem:[%s4056_s11] sm:$0x1] }
 0x5a8   : > { %v2964_v39 = vpop.eup %2963  ;;  %2989 = vtanh.f32 %v2314_v25  ;;  %2460 = vmatprep.subr.mxu0 %v2432_v35  ;;  %v2392_v60 = vmul.f32 0.5, %v2962_v7  ;;  %v2426_v38 = vadd.f32 0.5, %v2394_v37  ;;  %v3057_v35 = vmov 1966171168   ;;  %v2446_v7 = vpop.permute.xlu0 %2445 }
 0x5a9   : > { %v2966_v51 = vpop.eup %2965  ;;  %2991 = vtanh.f32 %v2313_v52  ;;  %2461 = vmatpush1.msra.mxu0 %v2431_v3  ;;  %v2391_v24 = vmul.f32 0.5, %v2964_v39  ;;  %v2425_v57 = vadd.f32 0.5, %v2393_v33  ;;  %v2527_v12 = vunpack.c.l.s4 %v3057_v35 }
 0x5aa   : > { %v2968_v21 = vpop.eup %2967  ;;  %2462 = vmatprep.subr.mxu0 %v2430_v18  ;;  %v2390_v48 = vmul.f32 0.5, %v2966_v51  ;;  %v2424_v54 = vadd.f32 0.5, %v2392_v60  ;;  %v2451_v39 = vrot.slane %v2446_v7, %v541_v1 }
 0x5ab   : > { %v2970_v47 = vpop.eup %2969  ;;  %2463 = vmatpush1.msra.mxu0 %v2429_v34  ;;  %v2389_v41 = vmul.f32 0.5, %v2968_v21  ;;  %v2423_v46 = vadd.f32 0.5, %v2391_v24  ;;  %v2528_v26 = vunpack.c.0.s8 %v2527_v12 }
 0x5ac   : > { %v2972_v53 = vpop.eup %2971  ;;  %2464 = vmatprep.subr.mxu0 %v2428_v40  ;;  %v2388_v4 = vmul.f32 0.5, %v2970_v47  ;;  %v2422_v55 = vadd.f32 0.5, %v2390_v48 }
 0x5ad   : > { %v2974_v13 = vpop.eup %2973  ;;  %2465 = vmatpush1.msra.mxu0 %v2427_v28  ;;  %v2387_v49 = vmul.f32 0.5, %v2972_v53  ;;  %v2421_v45 = vadd.f32 0.5, %v2389_v41  ;;  %v2531_v33 = vsub.s32 %v2528_v26, %v3358_v62 }
 0x5ae   : > { %v2976_v8 = vpop.eup %2975  ;;  %2466 = vmatprep.subr.mxu0 %v2426_v38  ;;  %v2386_v61 = vmul.f32 0.5, %v2974_v13  ;;  %v2420_v63 = vadd.f32 0.5, %v2388_v4 }
 0x5af   : > { %v2978_v2 = vpop.eup %2977  ;;  %2467 = vmatpush1.msra.mxu0 %v2425_v57  ;;  %v2385_v36 = vmul.f32 0.5, %v2976_v8  ;;  %v2419_v50 = vadd.f32 0.5, %v2387_v49 }
 0x5b0   : > { %v2980_v44 = vpop.eup %2979  ;;  %2468 = vmatprep.subr.mxu0 %v2424_v54  ;;  %v2384_v29 = vmul.f32 0.5, %v2978_v2  ;;  %v2418_v17 = vadd.f32 0.5, %v2386_v61 }
 0x5b1   : > { %v2982_v58 = vpop.eup %2981  ;;  %2469 = vmatpush1.msra.mxu0 %v2423_v46  ;;  %v2383_v30 = vmul.f32 0.5, %v2980_v44  ;;  %v2417_v16 = vadd.f32 0.5, %v2385_v36 }
 0x5b2   : > { %v2984_v20 = vpop.eup %2983  ;;  %2470 = vmatprep.subr.mxu0 %v2422_v55  ;;  %v2382_v22 = vmul.f32 0.5, %v2982_v58  ;;  %v2416_v14 = vadd.f32 0.5, %v2384_v29 }
 0x5b3   : > { %v2986_v23 = vpop.eup %2985  ;;  %2471 = vmatpush1.msra.mxu0 %v2421_v45  ;;  %v2381_v15 = vmul.f32 0.5, %v2984_v20  ;;  %v2415_v27 = vadd.f32 0.5, %v2383_v30 }
 0x5b4   : > { %v2988_v11 = vpop.eup %2987  ;;  %2472 = vmatprep.subr.mxu0 %v2420_v63  ;;  %v2380_v56 = vmul.f32 0.5, %v2986_v23  ;;  %v2414_v0 = vadd.f32 0.5, %v2382_v22 }
 0x5b5   : > { %v2990_v10 = vpop.eup %2989  ;;  %2473 = vmatpush1.msra.mxu0 %v2419_v50  ;;  %v2379_v43 = vmul.f32 0.5, %v2988_v11  ;;  %v2413_v5 = vadd.f32 0.5, %v2381_v15 }
 0x5b6   : > { %v2992_v9 = vpop.eup %2991  ;;  %2474 = vmatprep.subr.mxu0 %v2418_v17  ;;  %v2378_v25 = vmul.f32 0.5, %v2990_v10  ;;  %v2412_v32 = vadd.f32 0.5, %v2380_v56 }
 0x5b7   : > { %2475 = vmatpush1.msra.mxu0 %v2417_v16  ;;  %v2377_v19 = vmul.f32 0.5, %v2992_v9  ;;  %v2411_v52 = vadd.f32 0.5, %v2379_v43 }
 0x5b8   : > { %2476 = vmatprep.subr.mxu0 %v2416_v14  ;;  %v2410_v31 = vadd.f32 0.5, %v2378_v25 }
 0x5b9   : > { %2477 = vmatpush1.msra.mxu0 %v2415_v27  ;;  %v2409_v6 = vadd.f32 0.5, %v2377_v19 }
 0x5ba   : > { %2478 = vmatprep.subr.mxu0 %v2414_v0 }
 0x5bb   : > { %2479 = vmatpush1.msra.mxu0 %v2413_v5 }
 0x5bc   : > { %2480 = vmatprep.subr.mxu0 %v2412_v32 }
 0x5bd   : > { %2481 = vmatpush1.msra.mxu0 %v2411_v52 }
 0x5be   : > { %2482 = vmatprep.subr.mxu0 %v2410_v31 }
 0x5bf   : > { %2483 = vmatpush1.msra.mxu0 %v2409_v6 }
 0x5c0   : > { %2517 = vmatmul.mubr.f32.vlgmr.msra.gmra.mxu0 %v2441_v42 }
 0x680   : > { %v2518_v3 = vpop.f32.mrf.mxu0 }
 0x681   : > { %v2519_v37 = vadd.f32 %v2518_v3, %v2451_v39 }
 0x682   : > { %v2520_v18 = vpop.f32.mrf.mxu0 }
 0x683   : > { %v2521_v51 = vadd.f32 %v2520_v18, %v2451_v39 }
 0x685   : > { %v2525_v34 = vcombine.low %v2519_v37, %v2521_v51 }
 0x687   : > { %v2532_v21 = vrot.slane %v2525_v34, %v2531_v33 }
 0x689   : > { %v2539_v40 = vrot.slane %v2532_v21, %v2531_v33 }
 0x68b   : > { %2545 = vst.msk [vmem:[%s434_s22] sm:$0x3] %vm2543_vm0, %v2539_v40 }
 0x68c   : > { %3006 = shalt.err (!%p3003_p3)
}
 0x68d   : > { %s3007_s1 = scalar_lea.hbm %s2559_s25, 32  ;;  %s3011_s22 = scalar_lea.hbm %s4058_s13, 128 }
 0x68e   : > { %p3008_p4 = scmp.ne.s32.totalorder %s2559_s25, %s3007_s1  ;;  %p3012_p9 = scmp.lt.s32.totalorder %s2559_s25, %s4058_s13 }
 0x68f   : > { %p3013_p10 = scmp.lt.s32.totalorder %s3011_s22, %s3007_s1 }
 0x690   : > { %p3009_p7 = pnand %p3008_p4, %p3170_p5 }
 0x691   : > { %p3014_p11 = por %p3013_p10, %p3012_p9 }
 0x692   : > { %p3010_p8 = pneg %p3009_p7 }
 0x694   : > { %p3015_p12 = pnand %p3014_p11, %p3010_p8 }
 0x696   : > { %3018 = shalt.err (!%p3015_p12)
}
 0x697   : > { %2629 = dma.vmem_to_hbm [thread:$0]  (%p3170_p5), %s2562_s23, 32, %s2559_s25, %s2547_s26  }
 0x698 PF: > { %p2635_p13 = scmp.ge.s32.totalorder %s3053_s30, 2  ;;  %s2573_s0 = sand.u32 1, %s3041_s27  }
 0x699   : > { %s2574_s14 = scalar_lea.sflag [#allocation4], %s2573_s0 }
 0x69a   : > { %p2632_p0 = pnand %p2635_p13, %p3174_p6 }
 0x69c   : > { %p2633_p1 = pneg %p2632_p0 }
 0x69e   : > { %3036 = dma.done.wait (%p2633_p1), %s2574_s14, 32  }
 0x69f   : > { %3038 = vsyncadd (%p2633_p1), %s2574_s14, 4294967264  ;;  %s4066_s1 = sld [smem:[#allocation6_spill]]  ;;  %p25_p2 = scmp.ge.s32.totalorder %s3157_s15, 6  }
 0x6a0   : > { %s4067_s27 = smov %s3045_s28  ;;  %s4068_s28 = smov %s3049_s29 }
 0x6a1   : > { %s4070_s30 = smov %s3157_s15  ;;  %27 = sbr.rel (!%p25_p2) target bundleno = 6 (0x6), region = 107 }
 0x6a5   : > { %s4069_s29 = smov %s4066_s1 }
 0x6a6   :  { %2579 = vsyncpa [#allocation4], 1 }
 0x6a7   :  { %2581 = vsyncpa [#allocation4 + $0x1], 1 }

</bundles_post_ra>
